<compile_context>
chip_gen: v7x
topology: tpu7x:2x2x1
jax: 0.10.0
libtpu: 0.0.40
codegen_flags: <defaults>
</compile_context>

<pallas_src>
import functools

import jax
import jax.numpy as jnp
from jax.experimental import pallas as pl
from jax.experimental.pallas import tpu as pltpu


def _round_up(x, m):
    return ((x + m - 1) // m) * m


# ------------------------------------------------------------------
# Fused kernel: one grid step == one LSTM layer; FC fused at the last layer.
# ------------------------------------------------------------------
def _fused_lstm_fc_kernel(x_ref, wih_ref, whh_ref, b_ref, fcw_ref, fcb_ref,
                          out_ref, seq_ref, gx_ref):
    layer = pl.program_id(0)
    num_layers = pl.num_programs(0)

    TB, F = x_ref.shape          # TB = T * Bp (time-major, batch padded)
    H, G = whh_ref.shape         # true hidden size, gate axis padded to 128*k
    Bp = out_ref.shape[0]        # batch padded to 8 sublanes
    T = TB // Bp

    # ---- Hoisted input projection: one MXU matmul per layer, off the serial
    # time path.  gates_x = input_seq @ W_ih^T + (b_ih + b_hh).
    @pl.when(layer == 0)
    def _():
        gx_ref[...] = (
            jnp.dot(x_ref[...].astype(jnp.bfloat16), wih_ref[...],
                    preferred_element_type=jnp.float32)
            + b_ref[...]
        )

    @pl.when(layer > 0)
    def _():
        # Deeper layers read the previous layer's hidden sequence (only the H
        # real lanes) against the first H rows of W_ih^T (rest are zero pad).
        gx_ref[...] = (
            jnp.dot(seq_ref[...].astype(jnp.bfloat16), wih_ref[0:H, :],
                    preferred_element_type=jnp.float32)
            + b_ref[...]
        )

    # ---- Serial recurrence over time (T is tiny & static -> full unroll so
    # the LLO scheduler sees it).  Only h @ W_hh + gate math is serial.
    c = jnp.zeros((Bp, H), jnp.float32)
    h_bf = jnp.zeros((Bp, H), jnp.bfloat16)
    for t in range(T):
        row = t * Bp
        gates = gx_ref[row:row + Bp, :]
        if t > 0:                               # h == 0 exactly at t == 0
            gates = gates + jnp.dot(h_bf, whh_ref[...],
                                    preferred_element_type=jnp.float32)
        # 2 transcendental launches per step: whole-vreg sigmoid + H-wide tanh.
        sig = jax.nn.sigmoid(gates)
        g_g = jnp.tanh(gates[:, 2 * H:3 * H])
        c = sig[:, H:2 * H] * c + sig[:, 0:H] * g_g
        h = sig[:, 3 * H:4 * H] * jnp.tanh(c)
        h_bf = h.astype(jnp.bfloat16)
        seq_ref[row:row + Bp, :] = h            # next layer's input sequence

    # ---- Final FC fused in, only on the last layer / last timestep.
    @pl.when(layer == num_layers - 1)
    def _():
        out_ref[...] = (
            jnp.dot(h_bf, fcw_ref[...], preferred_element_type=jnp.float32)
            + fcb_ref[...]
        ).astype(out_ref.dtype)


# ------------------------------------------------------------------
# Parameter handling
# ------------------------------------------------------------------
def init_params(key, input_size, hidden_size, num_layers, output_size):
    """Raw parameters mirroring torch.nn.LSTM / nn.Linear shapes."""
    bound = 1.0 / (hidden_size ** 0.5)
    params = {"layers": []}
    for layer in range(num_layers):
        d_in = input_size if layer == 0 else hidden_size
        key, k1, k2, k3, k4 = jax.random.split(key, 5)
        params["layers"].append({
            "w_ih": jax.random.uniform(k1, (4 * hidden_size, d_in),
                                       jnp.float32, -bound, bound),
            "w_hh": jax.random.uniform(k2, (4 * hidden_size, hidden_size),
                                       jnp.float32, -bound, bound),
            "b_ih": jax.random.uniform(k3, (4 * hidden_size,),
                                       jnp.float32, -bound, bound),
            "b_hh": jax.random.uniform(k4, (4 * hidden_size,),
                                       jnp.float32, -bound, bound),
        })
    key, k1, k2 = jax.random.split(key, 3)
    params["fc_w"] = jax.random.uniform(k1, (output_size, hidden_size),
                                        jnp.float32, -bound, bound)
    params["fc_b"] = jax.random.uniform(k2, (output_size,),
                                        jnp.float32, -bound, bound)
    return params


def pack_params(raw, input_size, hidden_size, num_layers, output_size):
    """Pad/stack raw params into the compact, lane-aligned kernel layout."""
    H = hidden_size
    O = output_size
    G = _round_up(4 * H, 128)                      # whole-gate-axis padding
    F = max(_round_up(input_size, 128), _round_up(H, 128))
    Op = _round_up(O, 128)

    wih_stack, whh_stack, b_stack = [], [], []
    for lp in raw["layers"]:
        w_ih = lp["w_ih"]                          # (4H, d_in), torch layout
        w_hh = lp["w_hh"]                          # (4H, H)
        d_in = w_ih.shape[1]

        wih_t = jnp.pad(w_ih.T, ((0, F - d_in), (0, G - 4 * H)))
        wih_stack.append(wih_t.astype(jnp.bfloat16))        # (F, G)

        whh_t = jnp.pad(w_hh.T, ((0, 0), (0, G - 4 * H)))
        whh_stack.append(whh_t.astype(jnp.bfloat16))         # (H, G)

        b = jnp.pad((lp["b_ih"] + lp["b_hh"]).reshape(1, -1),
                    ((0, 0), (0, G - 4 * H)))
        b_stack.append(b)                                    # (1, G) f32

    fc_w_t = jnp.pad(raw["fc_w"].T, ((0, 0), (0, Op - O))).astype(jnp.bfloat16)
    fc_b = jnp.pad(raw["fc_b"].reshape(1, -1), ((0, 0), (0, Op - O)))

    return {
        "w_ih": jnp.stack(wih_stack),   # (L, F, G)  bf16
        "w_hh": jnp.stack(whh_stack),   # (L, H, G)  bf16
        "bias": jnp.stack(b_stack),     # (L, 1, G)  f32
        "fc_w_t": fc_w_t,               # (H, Op)    bf16
        "fc_b": fc_b,                   # (1, Op)    f32
    }


# ------------------------------------------------------------------
# Forward wrapper
# ------------------------------------------------------------------
@functools.partial(jax.jit, static_argnames=("output_size",))
def pose_estimation_lstm_forward(packed, x, *, output_size):
    """x: (B, T, D) batch_first -> (B, output_size)."""
    B, T, D = x.shape
    L, F, G = packed["w_ih"].shape
    H = packed["w_hh"].shape[1]
    Op = packed["fc_w_t"].shape[1]
    Bp = _round_up(max(B, 1), 8)

    # Time-major, pad batch -> 8 sublanes, features -> F lanes, flatten.
    x_tbd = jnp.transpose(x, (1, 0, 2)).astype(jnp.float32)      # (T, B, D)
    x_pad = jnp.pad(x_tbd, ((0, 0), (0, Bp - B), (0, F - D)))    # (T, Bp, F)
    x_flat = x_pad.reshape(T * Bp, F)

    out_pad = pl.pallas_call(
        _fused_lstm_fc_kernel,
        out_shape=jax.ShapeDtypeStruct((Bp, Op), jnp.float32),
        grid=(L,),
        in_specs=[
            pl.BlockSpec((T * Bp, F), lambda l: (0, 0)),      # x (resident)
            pl.BlockSpec((None, F, G), lambda l: (l, 0, 0)),  # W_ih^T / layer
            pl.BlockSpec((None, H, G), lambda l: (l, 0, 0)),  # W_hh^T / layer
            pl.BlockSpec((None, 1, G), lambda l: (l, 0, 0)),  # b_ih+b_hh
            pl.BlockSpec((H, Op), lambda l: (0, 0)),          # W_fc^T (res.)
            pl.BlockSpec((1, Op), lambda l: (0, 0)),          # b_fc
        ],
        out_specs=pl.BlockSpec((Bp, Op), lambda l: (0, 0)),
        scratch_shapes=[
            pltpu.VMEM((T * Bp, H), jnp.float32),   # inter-layer hidden seq
            pltpu.VMEM((T * Bp, G), jnp.float32),   # hoisted gate pre-acts
        ],
        compiler_params=pltpu.CompilerParams(
            dimension_semantics=("arbitrary",),     # sequential over layers
        ),
    )(x_flat, packed["w_ih"], packed["w_hh"], packed["bias"],
      packed["fc_w_t"], packed["fc_b"])

    return out_pad[:B, :output_size]


# ------------------------------------------------------------------
# Pure-JAX f32 reference (unpadded) for correctness checking
# ------------------------------------------------------------------
def _reference_forward(raw, x):
    B, T, D = x.shape
    h_seq = jnp.transpose(x, (1, 0, 2)).astype(jnp.float32)
    for lp in raw["layers"]:
        H = lp["w_hh"].shape[1]
        h = jnp.zeros((B, H), jnp.float32)
        c = jnp.zeros((B, H), jnp.float32)
        outs = []
        for t in range(T):
            gates = (h_seq[t] @ lp["w_ih"].T + h @ lp["w_hh"].T
                     + lp["b_ih"] + lp["b_hh"])
            i = jax.nn.sigmoid(gates[:, 0 * H:1 * H])
            f = jax.nn.sigmoid(gates[:, 1 * H:2 * H])
            g = jnp.tanh(gates[:, 2 * H:3 * H])
            o = jax.nn.sigmoid(gates[:, 3 * H:4 * H])
            c = f * c + i * g
            h = o * jnp.tanh(c)
            outs.append(h)
        h_seq = jnp.stack(outs, axis=0)
    return h_seq[-1] @ raw["fc_w"].T + raw["fc_b"]


if __name__ == "__main__":
    # Small shapes consistent with the module's forward.
    batch, seq_len = 2, 8
    input_size, hidden_size, num_layers, output_size = 16, 32, 2, 7

    key = jax.random.PRNGKey(0)
    key, pk, xk = jax.random.split(key, 3)
    raw_params = init_params(pk, input_size, hidden_size, num_layers,
                             output_size)
    packed = pack_params(raw_params, input_size, hidden_size, num_layers,
                         output_size)
    x = jax.random.normal(xk, (batch, seq_len, input_size), jnp.float32)

    out = pose_estimation_lstm_forward(packed, x, output_size=output_size)
    out = jax.block_until_ready(out)

    ref = _reference_forward(raw_params, x)
    assert out.shape == (batch, output_size), out.shape
    # bf16 matmul weights (f32 accumulation/elementwise) -> loosened tolerance.
    assert jnp.allclose(out, ref, atol=5e-2, rtol=5e-2), "mismatch vs reference"

    print("KERNEL_OK")
</pallas_src>

<mosaic_0001>
module attributes {stable_mosaic.version = 11 : i64} {
  func.func @_fused_lstm_fc_kernel(%arg0: i32, %arg1: memref<64x128xf32, #tpu.memory_space<vmem>>, %arg2: memref<1x128x128xbf16, #tpu.memory_space<vmem>>, %arg3: memref<1x32x128xbf16, #tpu.memory_space<vmem>>, %arg4: memref<1x1x128xf32, #tpu.memory_space<vmem>>, %arg5: memref<32x128xbf16, #tpu.memory_space<vmem>>, %arg6: memref<1x128xf32, #tpu.memory_space<vmem>>, %arg7: memref<8x128xf32, #tpu.memory_space<vmem>>, %arg8: memref<64x32xf32, #tpu.memory_space<vmem>>, %arg9: memref<64x128xf32, #tpu.memory_space<vmem>>) attributes {dimension_semantics = [#tpu.dimension_semantics<arbitrary>], iteration_bounds = array<i64: 2>, scalar_prefetch = 0 : i64, scratch_operands = 2 : i64, tpu.core_type = #tpu.core_type<tc>, window_params = [{pipeline_mode = #tpu.pipeline_mode<synchronous>, transform_indices = @transform_0, window_bounds = array<i64: 64, 128>}, {transform_indices = @transform_1, window_bounds = array<i64: 1, 128, 128>}, {transform_indices = @transform_2, window_bounds = array<i64: 1, 32, 128>}, {transform_indices = @transform_3, window_bounds = array<i64: 1, 1, 128>}, {pipeline_mode = #tpu.pipeline_mode<synchronous>, transform_indices = @transform_4, window_bounds = array<i64: 32, 128>}, {pipeline_mode = #tpu.pipeline_mode<synchronous>, transform_indices = @transform_5, window_bounds = array<i64: 1, 128>}, {pipeline_mode = #tpu.pipeline_mode<synchronous>, transform_indices = @transform_6, window_bounds = array<i64: 8, 128>}]} {
    %c0_i32 = arith.constant 0 : i32
    %0 = arith.cmpi eq, %arg0, %c0_i32 : i32
    %1 = arith.extui %0 : i1 to i32
    %c0_i32_0 = arith.constant 0 : i32
    %2 = arith.cmpi ne, %1, %c0_i32_0 : i32
    scf.if %2 {
      %c0_64 = arith.constant 0 : index
      %c0_65 = arith.constant 0 : index
      %182 = vector.load %arg1[%c0_64, %c0_65] : memref<64x128xf32, #tpu.memory_space<vmem>>, vector<64x128xf32>
      %183 = arith.truncf %182 : vector<64x128xf32> to vector<64x128xbf16>
      %c0_66 = arith.constant 0 : index
      %c0_67 = arith.constant 0 : index
      %c0_68 = arith.constant 0 : index
      %184 = vector.load %arg2[%c0_66, %c0_67, %c0_68] : memref<1x128x128xbf16, #tpu.memory_space<vmem>>, vector<1x128x128xbf16>
      %185 = vector.shape_cast %184 : vector<1x128x128xbf16> to vector<128x128xbf16>
      %cst_69 = arith.constant dense<0.000000e+00> : vector<64x128xf32>
      %186 = tpu.matmul %183, %185, %cst_69 {dimension_numbers = #tpu.dot_dimension_numbers<[1], [0], [0], [1], [0, 0, 1, 1], [], []>} : vector<64x128xbf16>, vector<128x128xbf16>, vector<64x128xf32> -> vector<64x128xf32>
      %c0_70 = arith.constant 0 : index
      %c0_71 = arith.constant 0 : index
      %c0_72 = arith.constant 0 : index
      %187 = vector.load %arg4[%c0_70, %c0_71, %c0_72] : memref<1x1x128xf32, #tpu.memory_space<vmem>>, vector<1x1x128xf32>
      %188 = vector.shape_cast %187 : vector<1x1x128xf32> to vector<1x128xf32>
      %189 = vector.broadcast %188 : vector<1x128xf32> to vector<64x128xf32>
      %190 = arith.addf %186, %189 : vector<64x128xf32>
      %c0_73 = arith.constant 0 : index
      %c0_74 = arith.constant 0 : index
      %191 = vector.load %arg9[%c0_73, %c0_74] : memref<64x128xf32, #tpu.memory_space<vmem>>, vector<64x128xf32>
      tpu.vector_store %arg9[%c0_73, %c0_74], %190 {strides = array<i32>} : memref<64x128xf32, #tpu.memory_space<vmem>>, vector<64x128xf32>,
    } else {
    }
    %c0_i32_1 = arith.constant 0 : i32
    %3 = arith.cmpi sgt, %arg0, %c0_i32_1 : i32
    %4 = arith.extui %3 : i1 to i32
    %c0_i32_2 = arith.constant 0 : i32
    %5 = arith.cmpi ne, %4, %c0_i32_2 : i32
    scf.if %5 {
      %c0_64 = arith.constant 0 : index
      %c0_65 = arith.constant 0 : index
      %182 = vector.load %arg8[%c0_64, %c0_65] : memref<64x32xf32, #tpu.memory_space<vmem>>, vector<64x32xf32>
      %183 = arith.truncf %182 : vector<64x32xf32> to vector<64x32xbf16>
      %c0_66 = arith.constant 0 : index
      %c0_67 = arith.constant 0 : index
      %c0_68 = arith.constant 0 : index
      %184 = vector.load %arg2[%c0_66, %c0_67, %c0_68] : memref<1x128x128xbf16, #tpu.memory_space<vmem>>, vector<1x32x128xbf16>
      %185 = vector.shape_cast %184 : vector<1x32x128xbf16> to vector<32x128xbf16>
      %cst_69 = arith.constant dense<0.000000e+00> : vector<64x128xf32>
      %186 = tpu.matmul %183, %185, %cst_69 {dimension_numbers = #tpu.dot_dimension_numbers<[1], [0], [0], [1], [0, 0, 1, 1], [], []>} : vector<64x32xbf16>, vector<32x128xbf16>, vector<64x128xf32> -> vector<64x128xf32>
      %c0_70 = arith.constant 0 : index
      %c0_71 = arith.constant 0 : index
      %c0_72 = arith.constant 0 : index
      %187 = vector.load %arg4[%c0_70, %c0_71, %c0_72] : memref<1x1x128xf32, #tpu.memory_space<vmem>>, vector<1x1x128xf32>
      %188 = vector.shape_cast %187 : vector<1x1x128xf32> to vector<1x128xf32>
      %189 = vector.broadcast %188 : vector<1x128xf32> to vector<64x128xf32>
      %190 = arith.addf %186, %189 : vector<64x128xf32>
      %c0_73 = arith.constant 0 : index
      %c0_74 = arith.constant 0 : index
      %191 = vector.load %arg9[%c0_73, %c0_74] : memref<64x128xf32, #tpu.memory_space<vmem>>, vector<64x128xf32>
      tpu.vector_store %arg9[%c0_73, %c0_74], %190 {strides = array<i32>} : memref<64x128xf32, #tpu.memory_space<vmem>>, vector<64x128xf32>,
    } else {
    }
    %cst = arith.constant 0.000000e+00 : f32
    %6 = vector.broadcast %cst : f32 to vector<8x32xf32>
    %c0 = arith.constant 0 : index
    %c0_3 = arith.constant 0 : index
    %7 = vector.load %arg9[%c0, %c0_3] : memref<64x128xf32, #tpu.memory_space<vmem>>, vector<8x128xf32>
    %8 = arith.negf %7 : vector<8x128xf32>
    %9 = math.exp %8 : vector<8x128xf32>
    %cst_4 = arith.constant 1.000000e+00 : f32
    %10 = vector.broadcast %cst_4 : f32 to vector<8x128xf32>
    %11 = arith.addf %10, %9 : vector<8x128xf32>
    %12 = arith.divf %10, %11 : vector<8x128xf32>
    %13 = vector.extract_strided_slice %7 {offsets = [0, 64], sizes = [8, 32], strides = [1, 1]} : vector<8x128xf32> to vector<8x32xf32>
    %14 = math.tanh %13 : vector<8x32xf32>
    %15 = vector.extract_strided_slice %12 {offsets = [0, 32], sizes = [8, 32], strides = [1, 1]} : vector<8x128xf32> to vector<8x32xf32>
    %16 = arith.mulf %15, %6 : vector<8x32xf32>
    %17 = vector.extract_strided_slice %12 {offsets = [0, 0], sizes = [8, 32], strides = [1, 1]} : vector<8x128xf32> to vector<8x32xf32>
    %18 = arith.mulf %17, %14 : vector<8x32xf32>
    %19 = arith.addf %16, %18 : vector<8x32xf32>
    %20 = vector.extract_strided_slice %12 {offsets = [0, 96], sizes = [8, 32], strides = [1, 1]} : vector<8x128xf32> to vector<8x32xf32>
    %21 = math.tanh %19 : vector<8x32xf32>
    %22 = arith.mulf %20, %21 : vector<8x32xf32>
    %23 = arith.truncf %22 : vector<8x32xf32> to vector<8x32xbf16>
    %c0_5 = arith.constant 0 : index
    %c0_6 = arith.constant 0 : index
    %24 = vector.load %arg8[%c0_5, %c0_6] : memref<64x32xf32, #tpu.memory_space<vmem>>, vector<8x32xf32>
    tpu.vector_store %arg8[%c0_5, %c0_6], %22 {strides = array<i32>} : memref<64x32xf32, #tpu.memory_space<vmem>>, vector<8x32xf32>,
    %c8 = arith.constant 8 : index
    %c0_7 = arith.constant 0 : index
    %25 = vector.load %arg9[%c8, %c0_7] : memref<64x128xf32, #tpu.memory_space<vmem>>, vector<8x128xf32>
    %c0_8 = arith.constant 0 : index
    %c0_9 = arith.constant 0 : index
    %c0_10 = arith.constant 0 : index
    %26 = vector.load %arg3[%c0_8, %c0_9, %c0_10] : memref<1x32x128xbf16, #tpu.memory_space<vmem>>, vector<1x32x128xbf16>
    %27 = vector.shape_cast %26 : vector<1x32x128xbf16> to vector<32x128xbf16>
    %cst_11 = arith.constant dense<0.000000e+00> : vector<8x128xf32>
    %28 = tpu.matmul %23, %27, %cst_11 {dimension_numbers = #tpu.dot_dimension_numbers<[1], [0], [0], [1], [0, 0, 1, 1], [], []>} : vector<8x32xbf16>, vector<32x128xbf16>, vector<8x128xf32> -> vector<8x128xf32>
    %29 = arith.addf %25, %28 : vector<8x128xf32>
    %30 = arith.negf %29 : vector<8x128xf32>
    %31 = math.exp %30 : vector<8x128xf32>
    %cst_12 = arith.constant 1.000000e+00 : f32
    %32 = vector.broadcast %cst_12 : f32 to vector<8x128xf32>
    %33 = arith.addf %32, %31 : vector<8x128xf32>
    %34 = arith.divf %32, %33 : vector<8x128xf32>
    %35 = vector.extract_strided_slice %29 {offsets = [0, 64], sizes = [8, 32], strides = [1, 1]} : vector<8x128xf32> to vector<8x32xf32>
    %36 = math.tanh %35 : vector<8x32xf32>
    %37 = vector.extract_strided_slice %34 {offsets = [0, 32], sizes = [8, 32], strides = [1, 1]} : vector<8x128xf32> to vector<8x32xf32>
    %38 = arith.mulf %37, %19 : vector<8x32xf32>
    %39 = vector.extract_strided_slice %34 {offsets = [0, 0], sizes = [8, 32], strides = [1, 1]} : vector<8x128xf32> to vector<8x32xf32>
    %40 = arith.mulf %39, %36 : vector<8x32xf32>
    %41 = arith.addf %38, %40 : vector<8x32xf32>
    %42 = vector.extract_strided_slice %34 {offsets = [0, 96], sizes = [8, 32], strides = [1, 1]} : vector<8x128xf32> to vector<8x32xf32>
    %43 = math.tanh %41 : vector<8x32xf32>
    %44 = arith.mulf %42, %43 : vector<8x32xf32>
    %45 = arith.truncf %44 : vector<8x32xf32> to vector<8x32xbf16>
    %c8_13 = arith.constant 8 : index
    %c0_14 = arith.constant 0 : index
    %46 = vector.load %arg8[%c8_13, %c0_14] : memref<64x32xf32, #tpu.memory_space<vmem>>, vector<8x32xf32>
    tpu.vector_store %arg8[%c8_13, %c0_14], %44 {strides = array<i32>} : memref<64x32xf32, #tpu.memory_space<vmem>>, vector<8x32xf32>,
    %c16 = arith.constant 16 : index
    %c0_15 = arith.constant 0 : index
    %47 = vector.load %arg9[%c16, %c0_15] : memref<64x128xf32, #tpu.memory_space<vmem>>, vector<8x128xf32>
    %c0_16 = arith.constant 0 : index
    %c0_17 = arith.constant 0 : index
    %c0_18 = arith.constant 0 : index
    %48 = vector.load %arg3[%c0_16, %c0_17, %c0_18] : memref<1x32x128xbf16, #tpu.memory_space<vmem>>, vector<1x32x128xbf16>
    %49 = vector.shape_cast %48 : vector<1x32x128xbf16> to vector<32x128xbf16>
    %cst_19 = arith.constant dense<0.000000e+00> : vector<8x128xf32>
    %50 = tpu.matmul %45, %49, %cst_19 {dimension_numbers = #tpu.dot_dimension_numbers<[1], [0], [0], [1], [0, 0, 1, 1], [], []>} : vector<8x32xbf16>, vector<32x128xbf16>, vector<8x128xf32> -> vector<8x128xf32>
    %51 = arith.addf %47, %50 : vector<8x128xf32>
    %52 = arith.negf %51 : vector<8x128xf32>
    %53 = math.exp %52 : vector<8x128xf32>
    %cst_20 = arith.constant 1.000000e+00 : f32
    %54 = vector.broadcast %cst_20 : f32 to vector<8x128xf32>
    %55 = arith.addf %54, %53 : vector<8x128xf32>
    %56 = arith.divf %54, %55 : vector<8x128xf32>
    %57 = vector.extract_strided_slice %51 {offsets = [0, 64], sizes = [8, 32], strides = [1, 1]} : vector<8x128xf32> to vector<8x32xf32>
    %58 = math.tanh %57 : vector<8x32xf32>
    %59 = vector.extract_strided_slice %56 {offsets = [0, 32], sizes = [8, 32], strides = [1, 1]} : vector<8x128xf32> to vector<8x32xf32>
    %60 = arith.mulf %59, %41 : vector<8x32xf32>
    %61 = vector.extract_strided_slice %56 {offsets = [0, 0], sizes = [8, 32], strides = [1, 1]} : vector<8x128xf32> to vector<8x32xf32>
    %62 = arith.mulf %61, %58 : vector<8x32xf32>
    %63 = arith.addf %60, %62 : vector<8x32xf32>
    %64 = vector.extract_strided_slice %56 {offsets = [0, 96], sizes = [8, 32], strides = [1, 1]} : vector<8x128xf32> to vector<8x32xf32>
    %65 = math.tanh %63 : vector<8x32xf32>
    %66 = arith.mulf %64, %65 : vector<8x32xf32>
    %67 = arith.truncf %66 : vector<8x32xf32> to vector<8x32xbf16>
    %c16_21 = arith.constant 16 : index
    %c0_22 = arith.constant 0 : index
    %68 = vector.load %arg8[%c16_21, %c0_22] : memref<64x32xf32, #tpu.memory_space<vmem>>, vector<8x32xf32>
    tpu.vector_store %arg8[%c16_21, %c0_22], %66 {strides = array<i32>} : memref<64x32xf32, #tpu.memory_space<vmem>>, vector<8x32xf32>,
    %c24 = arith.constant 24 : index
    %c0_23 = arith.constant 0 : index
    %69 = vector.load %arg9[%c24, %c0_23] : memref<64x128xf32, #tpu.memory_space<vmem>>, vector<8x128xf32>
    %c0_24 = arith.constant 0 : index
    %c0_25 = arith.constant 0 : index
    %c0_26 = arith.constant 0 : index
    %70 = vector.load %arg3[%c0_24, %c0_25, %c0_26] : memref<1x32x128xbf16, #tpu.memory_space<vmem>>, vector<1x32x128xbf16>
    %71 = vector.shape_cast %70 : vector<1x32x128xbf16> to vector<32x128xbf16>
    %cst_27 = arith.constant dense<0.000000e+00> : vector<8x128xf32>
    %72 = tpu.matmul %67, %71, %cst_27 {dimension_numbers = #tpu.dot_dimension_numbers<[1], [0], [0], [1], [0, 0, 1, 1], [], []>} : vector<8x32xbf16>, vector<32x128xbf16>, vector<8x128xf32> -> vector<8x128xf32>
    %73 = arith.addf %69, %72 : vector<8x128xf32>
    %74 = arith.negf %73 : vector<8x128xf32>
    %75 = math.exp %74 : vector<8x128xf32>
    %cst_28 = arith.constant 1.000000e+00 : f32
    %76 = vector.broadcast %cst_28 : f32 to vector<8x128xf32>
    %77 = arith.addf %76, %75 : vector<8x128xf32>
    %78 = arith.divf %76, %77 : vector<8x128xf32>
    %79 = vector.extract_strided_slice %73 {offsets = [0, 64], sizes = [8, 32], strides = [1, 1]} : vector<8x128xf32> to vector<8x32xf32>
    %80 = math.tanh %79 : vector<8x32xf32>
    %81 = vector.extract_strided_slice %78 {offsets = [0, 32], sizes = [8, 32], strides = [1, 1]} : vector<8x128xf32> to vector<8x32xf32>
    %82 = arith.mulf %81, %63 : vector<8x32xf32>
    %83 = vector.extract_strided_slice %78 {offsets = [0, 0], sizes = [8, 32], strides = [1, 1]} : vector<8x128xf32> to vector<8x32xf32>
    %84 = arith.mulf %83, %80 : vector<8x32xf32>
    %85 = arith.addf %82, %84 : vector<8x32xf32>
    %86 = vector.extract_strided_slice %78 {offsets = [0, 96], sizes = [8, 32], strides = [1, 1]} : vector<8x128xf32> to vector<8x32xf32>
    %87 = math.tanh %85 : vector<8x32xf32>
    %88 = arith.mulf %86, %87 : vector<8x32xf32>
    %89 = arith.truncf %88 : vector<8x32xf32> to vector<8x32xbf16>
    %c24_29 = arith.constant 24 : index
    %c0_30 = arith.constant 0 : index
    %90 = vector.load %arg8[%c24_29, %c0_30] : memref<64x32xf32, #tpu.memory_space<vmem>>, vector<8x32xf32>
    tpu.vector_store %arg8[%c24_29, %c0_30], %88 {strides = array<i32>} : memref<64x32xf32, #tpu.memory_space<vmem>>, vector<8x32xf32>,
    %c32 = arith.constant 32 : index
    %c0_31 = arith.constant 0 : index
    %91 = vector.load %arg9[%c32, %c0_31] : memref<64x128xf32, #tpu.memory_space<vmem>>, vector<8x128xf32>
    %c0_32 = arith.constant 0 : index
    %c0_33 = arith.constant 0 : index
    %c0_34 = arith.constant 0 : index
    %92 = vector.load %arg3[%c0_32, %c0_33, %c0_34] : memref<1x32x128xbf16, #tpu.memory_space<vmem>>, vector<1x32x128xbf16>
    %93 = vector.shape_cast %92 : vector<1x32x128xbf16> to vector<32x128xbf16>
    %cst_35 = arith.constant dense<0.000000e+00> : vector<8x128xf32>
    %94 = tpu.matmul %89, %93, %cst_35 {dimension_numbers = #tpu.dot_dimension_numbers<[1], [0], [0], [1], [0, 0, 1, 1], [], []>} : vector<8x32xbf16>, vector<32x128xbf16>, vector<8x128xf32> -> vector<8x128xf32>
    %95 = arith.addf %91, %94 : vector<8x128xf32>
    %96 = arith.negf %95 : vector<8x128xf32>
    %97 = math.exp %96 : vector<8x128xf32>
    %cst_36 = arith.constant 1.000000e+00 : f32
    %98 = vector.broadcast %cst_36 : f32 to vector<8x128xf32>
    %99 = arith.addf %98, %97 : vector<8x128xf32>
    %100 = arith.divf %98, %99 : vector<8x128xf32>
    %101 = vector.extract_strided_slice %95 {offsets = [0, 64], sizes = [8, 32], strides = [1, 1]} : vector<8x128xf32> to vector<8x32xf32>
    %102 = math.tanh %101 : vector<8x32xf32>
    %103 = vector.extract_strided_slice %100 {offsets = [0, 32], sizes = [8, 32], strides = [1, 1]} : vector<8x128xf32> to vector<8x32xf32>
    %104 = arith.mulf %103, %85 : vector<8x32xf32>
    %105 = vector.extract_strided_slice %100 {offsets = [0, 0], sizes = [8, 32], strides = [1, 1]} : vector<8x128xf32> to vector<8x32xf32>
    %106 = arith.mulf %105, %102 : vector<8x32xf32>
    %107 = arith.addf %104, %106 : vector<8x32xf32>
    %108 = vector.extract_strided_slice %100 {offsets = [0, 96], sizes = [8, 32], strides = [1, 1]} : vector<8x128xf32> to vector<8x32xf32>
    %109 = math.tanh %107 : vector<8x32xf32>
    %110 = arith.mulf %108, %109 : vector<8x32xf32>
    %111 = arith.truncf %110 : vector<8x32xf32> to vector<8x32xbf16>
    %c32_37 = arith.constant 32 : index
    %c0_38 = arith.constant 0 : index
    %112 = vector.load %arg8[%c32_37, %c0_38] : memref<64x32xf32, #tpu.memory_space<vmem>>, vector<8x32xf32>
    tpu.vector_store %arg8[%c32_37, %c0_38], %110 {strides = array<i32>} : memref<64x32xf32, #tpu.memory_space<vmem>>, vector<8x32xf32>,
    %c40 = arith.constant 40 : index
    %c0_39 = arith.constant 0 : index
    %113 = vector.load %arg9[%c40, %c0_39] : memref<64x128xf32, #tpu.memory_space<vmem>>, vector<8x128xf32>
    %c0_40 = arith.constant 0 : index
    %c0_41 = arith.constant 0 : index
    %c0_42 = arith.constant 0 : index
    %114 = vector.load %arg3[%c0_40, %c0_41, %c0_42] : memref<1x32x128xbf16, #tpu.memory_space<vmem>>, vector<1x32x128xbf16>
    %115 = vector.shape_cast %114 : vector<1x32x128xbf16> to vector<32x128xbf16>
    %cst_43 = arith.constant dense<0.000000e+00> : vector<8x128xf32>
    %116 = tpu.matmul %111, %115, %cst_43 {dimension_numbers = #tpu.dot_dimension_numbers<[1], [0], [0], [1], [0, 0, 1, 1], [], []>} : vector<8x32xbf16>, vector<32x128xbf16>, vector<8x128xf32> -> vector<8x128xf32>
    %117 = arith.addf %113, %116 : vector<8x128xf32>
    %118 = arith.negf %117 : vector<8x128xf32>
    %119 = math.exp %118 : vector<8x128xf32>
    %cst_44 = arith.constant 1.000000e+00 : f32
    %120 = vector.broadcast %cst_44 : f32 to vector<8x128xf32>
    %121 = arith.addf %120, %119 : vector<8x128xf32>
    %122 = arith.divf %120, %121 : vector<8x128xf32>
    %123 = vector.extract_strided_slice %117 {offsets = [0, 64], sizes = [8, 32], strides = [1, 1]} : vector<8x128xf32> to vector<8x32xf32>
    %124 = math.tanh %123 : vector<8x32xf32>
    %125 = vector.extract_strided_slice %122 {offsets = [0, 32], sizes = [8, 32], strides = [1, 1]} : vector<8x128xf32> to vector<8x32xf32>
    %126 = arith.mulf %125, %107 : vector<8x32xf32>
    %127 = vector.extract_strided_slice %122 {offsets = [0, 0], sizes = [8, 32], strides = [1, 1]} : vector<8x128xf32> to vector<8x32xf32>
    %128 = arith.mulf %127, %124 : vector<8x32xf32>
    %129 = arith.addf %126, %128 : vector<8x32xf32>
    %130 = vector.extract_strided_slice %122 {offsets = [0, 96], sizes = [8, 32], strides = [1, 1]} : vector<8x128xf32> to vector<8x32xf32>
    %131 = math.tanh %129 : vector<8x32xf32>
    %132 = arith.mulf %130, %131 : vector<8x32xf32>
    %133 = arith.truncf %132 : vector<8x32xf32> to vector<8x32xbf16>
    %c40_45 = arith.constant 40 : index
    %c0_46 = arith.constant 0 : index
    %134 = vector.load %arg8[%c40_45, %c0_46] : memref<64x32xf32, #tpu.memory_space<vmem>>, vector<8x32xf32>
    tpu.vector_store %arg8[%c40_45, %c0_46], %132 {strides = array<i32>} : memref<64x32xf32, #tpu.memory_space<vmem>>, vector<8x32xf32>,
    %c48 = arith.constant 48 : index
    %c0_47 = arith.constant 0 : index
    %135 = vector.load %arg9[%c48, %c0_47] : memref<64x128xf32, #tpu.memory_space<vmem>>, vector<8x128xf32>
    %c0_48 = arith.constant 0 : index
    %c0_49 = arith.constant 0 : index
    %c0_50 = arith.constant 0 : index
    %136 = vector.load %arg3[%c0_48, %c0_49, %c0_50] : memref<1x32x128xbf16, #tpu.memory_space<vmem>>, vector<1x32x128xbf16>
    %137 = vector.shape_cast %136 : vector<1x32x128xbf16> to vector<32x128xbf16>
    %cst_51 = arith.constant dense<0.000000e+00> : vector<8x128xf32>
    %138 = tpu.matmul %133, %137, %cst_51 {dimension_numbers = #tpu.dot_dimension_numbers<[1], [0], [0], [1], [0, 0, 1, 1], [], []>} : vector<8x32xbf16>, vector<32x128xbf16>, vector<8x128xf32> -> vector<8x128xf32>
    %139 = arith.addf %135, %138 : vector<8x128xf32>
    %140 = arith.negf %139 : vector<8x128xf32>
    %141 = math.exp %140 : vector<8x128xf32>
    %cst_52 = arith.constant 1.000000e+00 : f32
    %142 = vector.broadcast %cst_52 : f32 to vector<8x128xf32>
    %143 = arith.addf %142, %141 : vector<8x128xf32>
    %144 = arith.divf %142, %143 : vector<8x128xf32>
    %145 = vector.extract_strided_slice %139 {offsets = [0, 64], sizes = [8, 32], strides = [1, 1]} : vector<8x128xf32> to vector<8x32xf32>
    %146 = math.tanh %145 : vector<8x32xf32>
    %147 = vector.extract_strided_slice %144 {offsets = [0, 32], sizes = [8, 32], strides = [1, 1]} : vector<8x128xf32> to vector<8x32xf32>
    %148 = arith.mulf %147, %129 : vector<8x32xf32>
    %149 = vector.extract_strided_slice %144 {offsets = [0, 0], sizes = [8, 32], strides = [1, 1]} : vector<8x128xf32> to vector<8x32xf32>
    %150 = arith.mulf %149, %146 : vector<8x32xf32>
    %151 = arith.addf %148, %150 : vector<8x32xf32>
    %152 = vector.extract_strided_slice %144 {offsets = [0, 96], sizes = [8, 32], strides = [1, 1]} : vector<8x128xf32> to vector<8x32xf32>
    %153 = math.tanh %151 : vector<8x32xf32>
    %154 = arith.mulf %152, %153 : vector<8x32xf32>
    %155 = arith.truncf %154 : vector<8x32xf32> to vector<8x32xbf16>
    %c48_53 = arith.constant 48 : index
    %c0_54 = arith.constant 0 : index
    %156 = vector.load %arg8[%c48_53, %c0_54] : memref<64x32xf32, #tpu.memory_space<vmem>>, vector<8x32xf32>
    tpu.vector_store %arg8[%c48_53, %c0_54], %154 {strides = array<i32>} : memref<64x32xf32, #tpu.memory_space<vmem>>, vector<8x32xf32>,
    %c56 = arith.constant 56 : index
    %c0_55 = arith.constant 0 : index
    %157 = vector.load %arg9[%c56, %c0_55] : memref<64x128xf32, #tpu.memory_space<vmem>>, vector<8x128xf32>
    %c0_56 = arith.constant 0 : index
    %c0_57 = arith.constant 0 : index
    %c0_58 = arith.constant 0 : index
    %158 = vector.load %arg3[%c0_56, %c0_57, %c0_58] : memref<1x32x128xbf16, #tpu.memory_space<vmem>>, vector<1x32x128xbf16>
    %159 = vector.shape_cast %158 : vector<1x32x128xbf16> to vector<32x128xbf16>
    %cst_59 = arith.constant dense<0.000000e+00> : vector<8x128xf32>
    %160 = tpu.matmul %155, %159, %cst_59 {dimension_numbers = #tpu.dot_dimension_numbers<[1], [0], [0], [1], [0, 0, 1, 1], [], []>} : vector<8x32xbf16>, vector<32x128xbf16>, vector<8x128xf32> -> vector<8x128xf32>
    %161 = arith.addf %157, %160 : vector<8x128xf32>
    %162 = arith.negf %161 : vector<8x128xf32>
    %163 = math.exp %162 : vector<8x128xf32>
    %cst_60 = arith.constant 1.000000e+00 : f32
    %164 = vector.broadcast %cst_60 : f32 to vector<8x128xf32>
    %165 = arith.addf %164, %163 : vector<8x128xf32>
    %166 = arith.divf %164, %165 : vector<8x128xf32>
    %167 = vector.extract_strided_slice %161 {offsets = [0, 64], sizes = [8, 32], strides = [1, 1]} : vector<8x128xf32> to vector<8x32xf32>
    %168 = math.tanh %167 : vector<8x32xf32>
    %169 = vector.extract_strided_slice %166 {offsets = [0, 32], sizes = [8, 32], strides = [1, 1]} : vector<8x128xf32> to vector<8x32xf32>
    %170 = arith.mulf %169, %151 : vector<8x32xf32>
    %171 = vector.extract_strided_slice %166 {offsets = [0, 0], sizes = [8, 32], strides = [1, 1]} : vector<8x128xf32> to vector<8x32xf32>
    %172 = arith.mulf %171, %168 : vector<8x32xf32>
    %173 = arith.addf %170, %172 : vector<8x32xf32>
    %174 = vector.extract_strided_slice %166 {offsets = [0, 96], sizes = [8, 32], strides = [1, 1]} : vector<8x128xf32> to vector<8x32xf32>
    %175 = math.tanh %173 : vector<8x32xf32>
    %176 = arith.mulf %174, %175 : vector<8x32xf32>
    %177 = arith.truncf %176 : vector<8x32xf32> to vector<8x32xbf16>
    %c56_61 = arith.constant 56 : index
    %c0_62 = arith.constant 0 : index
    %178 = vector.load %arg8[%c56_61, %c0_62] : memref<64x32xf32, #tpu.memory_space<vmem>>, vector<8x32xf32>
    tpu.vector_store %arg8[%c56_61, %c0_62], %176 {strides = array<i32>} : memref<64x32xf32, #tpu.memory_space<vmem>>, vector<8x32xf32>,
    %c1_i32 = arith.constant 1 : i32
    %179 = arith.cmpi eq, %arg0, %c1_i32 : i32
    %180 = arith.extui %179 : i1 to i32
    %c0_i32_63 = arith.constant 0 : i32
    %181 = arith.cmpi ne, %180, %c0_i32_63 : i32
    scf.if %181 {
      %c0_64 = arith.constant 0 : index
      %c0_65 = arith.constant 0 : index
      %182 = vector.load %arg5[%c0_64, %c0_65] : memref<32x128xbf16, #tpu.memory_space<vmem>>, vector<32x128xbf16>
      %cst_66 = arith.constant dense<0.000000e+00> : vector<8x128xf32>
      %183 = tpu.matmul %177, %182, %cst_66 {dimension_numbers = #tpu.dot_dimension_numbers<[1], [0], [0], [1], [0, 0, 1, 1], [], []>} : vector<8x32xbf16>, vector<32x128xbf16>, vector<8x128xf32> -> vector<8x128xf32>
      %c0_67 = arith.constant 0 : index
      %c0_68 = arith.constant 0 : index
      %184 = vector.load %arg6[%c0_67, %c0_68] : memref<1x128xf32, #tpu.memory_space<vmem>>, vector<1x128xf32>
      %185 = vector.broadcast %184 : vector<1x128xf32> to vector<8x128xf32>
      %186 = arith.addf %183, %185 : vector<8x128xf32>
      %c0_69 = arith.constant 0 : index
      %c0_70 = arith.constant 0 : index
      %187 = vector.load %arg7[%c0_69, %c0_70] : memref<8x128xf32, #tpu.memory_space<vmem>>, vector<8x128xf32>
      tpu.vector_store %arg7[%c0_69, %c0_70], %186 {strides = array<i32>} : memref<8x128xf32, #tpu.memory_space<vmem>>, vector<8x128xf32>,
    } else {
    }
    return
  }
  func.func @transform_0(%arg0: i32) -> (i32, i32) {
    %c0_i32 = arith.constant 0 : i32
    %c0_i32_0 = arith.constant 0 : i32
    %c0_i32_1 = arith.constant 0 : i32
    return %c0_i32, %c0_i32_0 : i32, i32
  }
  func.func @transform_1(%arg0: i32) -> (i32, i32, i32) {
    %c0_i32 = arith.constant 0 : i32
    %c0_i32_0 = arith.constant 0 : i32
    %c0_i32_1 = arith.constant 0 : i32
    return %arg0, %c0_i32, %c0_i32_0 : i32, i32, i32
  }
  func.func @transform_2(%arg0: i32) -> (i32, i32, i32) {
    %c0_i32 = arith.constant 0 : i32
    %c0_i32_0 = arith.constant 0 : i32
    %c0_i32_1 = arith.constant 0 : i32
    return %arg0, %c0_i32, %c0_i32_0 : i32, i32, i32
  }
  func.func @transform_3(%arg0: i32) -> (i32, i32, i32) {
    %c0_i32 = arith.constant 0 : i32
    %c0_i32_0 = arith.constant 0 : i32
    %c0_i32_1 = arith.constant 0 : i32
    return %arg0, %c0_i32, %c0_i32_0 : i32, i32, i32
  }
  func.func @transform_4(%arg0: i32) -> (i32, i32) {
    %c0_i32 = arith.constant 0 : i32
    %c0_i32_0 = arith.constant 0 : i32
    %c0_i32_1 = arith.constant 0 : i32
    return %c0_i32, %c0_i32_0 : i32, i32
  }
  func.func @transform_5(%arg0: i32) -> (i32, i32) {
    %c0_i32 = arith.constant 0 : i32
    %c0_i32_0 = arith.constant 0 : i32
    %c0_i32_1 = arith.constant 0 : i32
    return %c0_i32, %c0_i32_0 : i32, i32
  }
  func.func @transform_6(%arg0: i32) -> (i32, i32) {
    %c0_i32 = arith.constant 0 : i32
    %c0_i32_0 = arith.constant 0 : i32
    %c0_i32_1 = arith.constant 0 : i32
    return %c0_i32, %c0_i32_0 : i32, i32
  }
}

</mosaic_0001>

<bundles_post_ra>
// kernel: pose_estimation_lstm_forward.1
= control target key start
LH: loop header
LB: loop body
LE: loop exit
PB: predicated region body
PF: predicated region fallthrough
CT: control target
= control target key end

     0   :  { %11 = vsyncpa [#allocation5], 0  ;;  %s2377_s0 = inlined_call_operand.vmem [shape: f32[64,128], index: 0, kind: input, shape index: {}]   ;;  %s2378_s1 = inlined_call_operand.vmem [shape: bf16[2,128,128], index: 1, kind: input, shape index: {}]   ;;  %s2379_s2 = inlined_call_operand.hbm [shape: bf16[2,32,128], index: 2, kind: input, shape index: {}]   ;;  %s2380_s3 = inlined_call_operand.vmem [shape: f32[2,1,128], index: 3, kind: input, shape index: {}]   ;;  %s2381_s4 = inlined_call_operand.hbm [shape: bf16[32,128], index: 4, kind: input, shape index: {}]   ;;  %s2382_s5 = inlined_call_operand.hbm [shape: f32[1,128], index: 5, kind: input, shape index: {}]   ;;  %s2383_s6 = inlined_call_operand.vmem [shape: f32[8,128], index: 6, kind: output, shape index: {}]  }
   0x1   :  { %13 = vsyncpa [#allocation5 + $0x1], 0 }
   0x2   :  { %14 = vsyncpa [#allocation7], 0  ;;  %s2011_s21 = smov 0   ;;  %s2013_s22 = smov 0  }
   0x3   :  { %s2015_s23 = smov 0   ;;  %s2017_s24 = smov 0  }
   0x4 LB: > { %s2030_s25 = sadd.s32 4294967295, %s1962_s24   ;;  %p87_p0 = scmp.ne.s32.totalorder %s1954_s22, %s1950_s21  ;;  %s1962_s24 = sphi %s2017_s24, %s2400_s24   ;;  %s1958_s23 = sphi %s2015_s23, %s2399_s23   ;;  %s1954_s22 = sphi %s2013_s22, %s2398_s22   ;;  %s1950_s21 = sphi %s2011_s21, %s2397_s21  }
   0x5   : > { %p2384_p1 = scmp.eq.s32.totalorder %s2030_s25, 0  ;;  %p1448_p2 = scmp.ge.s32.totalorder %s1962_s24, 1 }
   0x6   : > { %p187_p3 = scmp.lt.s32.totalorder %s1962_s24, 3  ;;  %s1964_s28 = smov [#allocation6]  }
   0x7   : > { %p2039_p5 = por %p2384_p1, %p87_p0  ;;  %s202_s29 = sshll.u32 %s1964_s28, 4  ;;  %s203_s29 = int_to_ptr.vmem [resolvable:$true] %s202_s29 }
   0x8   : > { %p2043_p6 = pnand %p1448_p2, %p187_p3  ;;  %s1965_s7 = smov [#allocation8]  }
   0x9   : > { %s2387_s26 = scalar_select %p2039_p5, 1, 0 }
   0xa   : > { %s2388_s27 = scalar_select %p2043_p6, 1, 0 }
   0xb   : > { %p1689_p7 = pneg %p2043_p6  ;;  %s216_s8 = sshll.u32 %s1965_s7, 4  ;;  %s2055_s8 = int_to_ptr.vmem [resolvable:$true] %s216_s8 }
   0xc   : > { %s1838_s11 = scalar_lea.hbm %s2381_s4, 256 }
   0xd   : > { %p2051_p8 = pnand %p1689_p7, %p2384_p1  ;;  %p1839_p9 = scmp.ne.s32.totalorder %s2381_s4, %s1838_s11 }
   0xe   : > { %p1845_p13 = scmp.lt.u32.totalorder %s1838_s11, %s2381_s4 }
   0xf   : > { %p1840_p10 = pneg %p2051_p8 }
  0x11   : > { %p1841_p11 = pnand %p1840_p10, %p1839_p9 }
  0x13   : > { %p1842_p12 = pneg %p1841_p11 }
  0x15   : > { %p1847_p0 = pnand %p1845_p13, %p1842_p12 }
  0x17   : > { %1850 = shalt.err (!%p1847_p0)
}
  0x18   : > { %s1851_s16 = scalar_lea.vmem %s203_s29, 256  ;;  %p1859_p4 = scmp.lt.s32.totalorder %s203_s29, %s203_s29 }
  0x19   : > { %p1852_p2 = scmp.ne.s32.totalorder %s203_s29, %s1851_s16  ;;  %p1860_p1 = scmp.lt.s32.totalorder %s1851_s16, %s1851_s16 }
  0x1b   : > { %p1854_p3 = pnand %p1852_p2, %p1840_p10  ;;  %p1861_p5 = por %p1860_p1, %p1859_p4 }
  0x1d   : > { %p1855_p7 = pneg %p1854_p3 }
  0x1f   : > { %p1862_p6 = pnand %p1861_p5, %p1855_p7 }
  0x21   : > { %1865 = shalt.err (!%p1862_p6)
}
  0x22   : > { %s1966_s17 = smov 64   ;;  %s1967_s18 = smov 4  }
  0x23   : > { %1692 = dma.hbm_to_vmem [thread:$0]  (!%p2051_p8), %s2381_s4, 256, %s203_s29, [#allocation7], %s1966_s17, %s1966_s17, %s1967_s18  }
  0x24   : > { %s1866_s7 = scalar_lea.hbm %s2382_s5, 16 }
  0x25   : > { %p1867_p1 = scmp.ne.s32.totalorder %s2382_s5, %s1866_s7  ;;  %p1873_p6 = scmp.lt.u32.totalorder %s1866_s7, %s2382_s5 }
  0x27   : > { %p1869_p4 = pnand %p1867_p1, %p1840_p10 }
  0x29   : > { %p1870_p5 = pneg %p1869_p4 }
  0x2b   : > { %p1875_p9 = pnand %p1873_p6, %p1870_p5 }
  0x2d   : > { %1878 = shalt.err (!%p1875_p9)
}
  0x2e   : > { %s1879_s29 = scalar_lea.vmem %s2055_s8, 16  ;;  %s1886_s13 = scalar_lea.vmem %s2055_s8, 32 }
  0x2f   : > { %p1880_p11 = scmp.ne.s32.totalorder %s2055_s8, %s1879_s29  ;;  %p1887_p0 = scmp.lt.s32.totalorder %s2055_s8, %s2055_s8 }
  0x30   : > { %p1888_p2 = scmp.lt.s32.totalorder %s1886_s13, %s1879_s29 }
  0x31   : > { %p1882_p12 = pnand %p1880_p11, %p1840_p10 }
  0x32   : > { %p1889_p3 = por %p1888_p2, %p1887_p0 }
  0x33   : > { %p1883_p13 = pneg %p1882_p12 }
  0x35   : > { %p1890_p7 = pnand %p1889_p3, %p1883_p13 }
  0x37   : > { %1893 = shalt.err (!%p1890_p7)
}
  0x38   : > { %1695 = dma.hbm_to_vmem [thread:$0]  (!%p2051_p8), %s2382_s5, 16, %s2055_s8, [#allocation7]  }
  0x39   : > { %s2109_s16 = sadd.s32 1, %s1962_s24   ;;  %s74_s19 = sadd.s32 1, %s1958_s23 }
  0x3a   : > { %s71_s30 = ssub.s32 %s1962_s24, %s2109_s16  ;;  %p81_p10 = scmp.ne.s32.totalorder %s1958_s23, %s1954_s22 }
  0x3b   : > { %p72_p1 = scmp.eq.s32.totalorder %s71_s30, 0  ;;  %p82_p4 = scmp.eq.s32.totalorder %s1962_s24, 0 }
  0x3c   : > { %p1702_p5 = scmp.lt.s32.totalorder %s1962_s24, 2  ;;  %s235_s20 = sand.u32 1, %s1958_s23  }
  0x3d   : > { %s2120_s21 = scalar_select %p72_p1, %s1958_s23, %s74_s19  }
  0x3e   : > { %p83_p6 = por %p82_p4, %p81_p10  ;;  %s1452_s28 = sshll.u32 %s235_s20, 4 }
  0x3f   : > { %s1515_s7 = sshll.u32 %s1962_s24, 8  ;;  %s239_s8 = scalar_lea.vmem [#allocation4], %s1452_s28 }
  0x40   : > { %s2126_s11 = scalar_lea.hbm %s2379_s2, %s1515_s7  ;;  %s246_s12 = sshll.u32 %s239_s8, 4  ;;  %s2132_s12 = int_to_ptr.vmem [resolvable:$true] %s246_s12 }
  0x41   : > { %p2128_p8 = pnand %p1702_p5, %p83_p6  ;;  %s2134_s24 = scalar_lea.sflag [#allocation5], %s235_s20 }
  0x42   : > { %s1894_s13 = scalar_lea.hbm %s2126_s11, 256  ;;  %s1899_s19 = scalar_lea.hbm %s2379_s2, 512 }
  0x43   : > { %p1895_p9 = scmp.ne.s32.totalorder %s2126_s11, %s1894_s13  ;;  %p1896_p11 = pneg %p2128_p8 }
  0x44   : > { %p1900_p0 = scmp.lt.u32.totalorder %s2126_s11, %s2379_s2  ;;  %p1901_p2 = scmp.lt.u32.totalorder %s1899_s19, %s1894_s13 }
  0x45   : > { %p1897_p12 = pnand %p1896_p11, %p1895_p9  ;;  %p1903_p7 = scmp.lt.u32.totalorder %s1894_s13, %s2126_s11 }
  0x46   : > { %p1902_p3 = por %p1901_p2, %p1900_p0 }
  0x47   : > { %p1898_p13 = pneg %p1897_p12 }
  0x48   : > { %p1904_p10 = por %p1903_p7, %p1902_p3 }
  0x4a   : > { %p1905_p1 = pnand %p1904_p10, %p1898_p13 }
  0x4c   : > { %1908 = shalt.err (!%p1905_p1)
}
  0x4d   : > { %s1909_s20 = scalar_lea.vmem %s2132_s12, 256  ;;  %s1968_s7 = smov [#allocation4]  }
  0x4e   : > { %p1910_p4 = scmp.ne.s32.totalorder %s2132_s12, %s1909_s20  ;;  %s1914_s9 = sshll.u32 %s1968_s7, 4  ;;  %s1915_s9 = int_to_ptr.vmem [resolvable:$false] %s1914_s9 }
  0x4f   : > { %s1916_s10 = scalar_lea.vmem %s1915_s9, 512  ;;  %p1917_p9 = scmp.lt.s32.totalorder %s2132_s12, %s1915_s9 }
  0x50   : > { %p1912_p5 = pnand %p1910_p4, %p1896_p11  ;;  %p1918_p12 = scmp.lt.s32.totalorder %s1916_s10, %s1909_s20 }
  0x52   : > { %p1913_p6 = pneg %p1912_p5  ;;  %p1919_p0 = por %p1918_p12, %p1917_p9 }
  0x54   : > { %p1920_p2 = pnand %p1919_p0, %p1913_p6 }
  0x56   : > { %1923 = shalt.err (!%p1920_p2)
}
  0x57   : > { %1699 = dma.hbm_to_vmem [thread:$0]  (!%p2128_p8), %s2126_s11, 256, %s2132_s12, %s2134_s24, %s1966_s17, %s1966_s17, %s1967_s18  }
  0x58   : > { %p2391_p11 = scmp.ne.s32.totalorder %s2388_s27, 0 }
  0x59   : > { %s266_s8 = sand.u32 (!%p2391_p11), 1, %s1954_s22   ;;  %p2392_p13 = scmp.ne.s32.totalorder (!%p2391_p11), %s2387_s26, 0 }
  0x5a   : > { %264 = sbr.rel (%p2391_p11) target bundleno = 6226 (0x1852), region = 44  ;;  %s1456_s13 = sshll.u32 (!%p2391_p11), %s266_s8, 4 }
  0x5b   : > { %s267_s14 = scalar_lea.sflag (!%p2391_p11), [#allocation5], %s266_s8  ;;  %s2168_s15 = scalar_lea.vmem (!%p2391_p11), [#allocation4], %s1456_s13 }
  0x61   : > { %1941 = dma.done.wait (%p2392_p13), %s267_s14, 256  }
  0x62   : > { %1943 = vsyncadd (%p2392_p13), %s267_s14, 4294967040  ;;  %p2393_p3 = scmp.eq.s32.totalorder %s2030_s25, 0 }
  0x64   : > { %1945 = dma.done.wait (%p2393_p3), [#allocation7], 272   ;;  %p2394_p8 = pmov %p2393_p3 }
  0x65   : > { %p310_p7 = scmp.lt.s32.totalorder %s2030_s25, 1  ;;  %p2395_p10 = scmp.ne.s32.totalorder %s2030_s25, 0 }
  0x66   : > { %1947 = vsyncadd (%p2394_p8), [#allocation7], 4294967024  ;;  %v323_v4 = vld [vmem:[%s2377_s0] sm:$0xff] (!%p2395_p10)  ;;  %v324_v5 = vld [vmem:[%s2377_s0 + $0x8] sm:$0xff] (!%p2395_p10) }
  0x67   : > { %s311_s27 = scalar_select %p310_p7, %s2030_s25, 1 }
  0x68   : > { %322 = sbr.rel (%p2395_p10) target bundleno = 358 (0x166), region = 60  ;;  %v327_v6 = vld [vmem:[%s2377_s0 + $0x20] sm:$0xff] (!%p2395_p10)  ;;  %v331_v7 = vpack.c.bf16 (!%p2395_p10), %v324_v5, %v323_v4  ;;  %v328_v8 = vld [vmem:[%s2377_s0 + $0x28] sm:$0xff] (!%p2395_p10)  ;;  %v325_v14 = vld [vmem:[%s2377_s0 + $0x10] sm:$0xff] (!%p2395_p10) }
  0x69   : > { %s1516_s17 = sshll.u32 %s311_s27, 6  ;;  %s2183_s12 = scalar_lea.vmem %s2380_s3, %s311_s27  ;;  %v333_v9 = vpack.c.bf16 (!%p2395_p10), %v328_v8, %v327_v6  ;;  %v326_v15 = vld [vmem:[%s2377_s0 + $0x18] sm:$0xff] (!%p2395_p10)  ;;  %v329_v16 = vld [vmem:[%s2377_s0 + $0x30] sm:$0xff] (!%p2395_p10) }
  0x6a   : > { %s2188_s26 = scalar_lea.vmem %s2378_s1, %s1516_s17  ;;  %1575 = vmatprep.mubr.bf16.mxu0 (!%p2395_p10), %v331_v7  ;;  %v330_v17 = vld [vmem:[%s2377_s0 + $0x38] sm:$0xff] (!%p2395_p10)  ;;  %v332_v18 = vpack.c.bf16 (!%p2395_p10), %v326_v15, %v325_v14  ;;  %v1462_v20 = vld [vmem:[%s2183_s12] ss:$0 sm:$0xff] (!%p2395_p10) }
  0x6b   : > { %v1748_v0 = vld [vmem:[%s2188_s26] sm:$0xff] (!%p2395_p10)   ;;  %v1749_v1 = vld [vmem:[%s2188_s26 + $0x8] sm:$0xff] (!%p2395_p10)   ;;  %v1750_v2 = vld [vmem:[%s2188_s26 + $0x10] sm:$0xff] (!%p2395_p10)   ;;  %1579 = vmatprep.mubr.bf16.mxu1 (!%p2395_p10), %v333_v9  ;;  %v334_v19 = vpack.c.bf16 (!%p2395_p10), %v330_v17, %v329_v16 }
  0x6c   : > { %1559 = vmatprep.subr.bf16.mxu0 (!%p2395_p10), %v1748_v0  ;;  %1659 = vmatprep.subr.bf16.mxu1 (!%p2395_p10), %v1748_v0  ;;  %v1751_v3 = vld [vmem:[%s2188_s26 + $0x18] sm:$0xff] (!%p2395_p10)   ;;  %v1752_v10 = vld [vmem:[%s2188_s26 + $0x20] sm:$0xff] (!%p2395_p10)   ;;  %v1753_v11 = vld [vmem:[%s2188_s26 + $0x28] sm:$0xff] (!%p2395_p10)  }
  0x6d   : > { %1560 = vmatpush3.bf16.msra.mxu0 (!%p2395_p10), %v1748_v0  ;;  %1667 = vmatpush3.bf16.msra.mxu1 (!%p2395_p10), %v1748_v0  ;;  %v1754_v12 = vld [vmem:[%s2188_s26 + $0x30] sm:$0xff] (!%p2395_p10)   ;;  %v1755_v13 = vld [vmem:[%s2188_s26 + $0x38] sm:$0xff] (!%p2395_p10)  }
  0x6e   : > { %1561 = vmatprep.subr.bf16.mxu0 (!%p2395_p10), %v1749_v1  ;;  %1660 = vmatprep.subr.bf16.mxu1 (!%p2395_p10), %v1749_v1 }
  0x71   : > { %1562 = vmatpush3.bf16.msra.mxu0 %v1749_v1  ;;  %1668 = vmatpush3.bf16.msra.mxu1 %v1749_v1 }
  0x72   : > { %1563 = vmatprep.subr.bf16.mxu0 %v1750_v2  ;;  %1661 = vmatprep.subr.bf16.mxu1 %v1750_v2 }
  0x75   : > { %1564 = vmatpush3.bf16.msra.mxu0 %v1750_v2  ;;  %1669 = vmatpush3.bf16.msra.mxu1 %v1750_v2 }
  0x76   : > { %1565 = vmatprep.subr.bf16.mxu0 %v1751_v3  ;;  %1662 = vmatprep.subr.bf16.mxu1 %v1751_v3 }
  0x79   : > { %1566 = vmatpush3.bf16.msra.mxu0 %v1751_v3  ;;  %1670 = vmatpush3.bf16.msra.mxu1 %v1751_v3 }
  0x7a   : > { %1567 = vmatprep.subr.bf16.mxu0 %v1752_v10  ;;  %1663 = vmatprep.subr.bf16.mxu1 %v1752_v10 }
  0x7d   : > { %1568 = vmatpush3.bf16.msra.mxu0 %v1752_v10  ;;  %1671 = vmatpush3.bf16.msra.mxu1 %v1752_v10 }
  0x7e   : > { %1569 = vmatprep.subr.bf16.mxu0 %v1753_v11  ;;  %1664 = vmatprep.subr.bf16.mxu1 %v1753_v11 }
  0x81   : > { %1570 = vmatpush3.bf16.msra.mxu0 %v1753_v11  ;;  %1672 = vmatpush3.bf16.msra.mxu1 %v1753_v11 }
  0x82   : > { %1571 = vmatprep.subr.bf16.mxu0 %v1754_v12  ;;  %1665 = vmatprep.subr.bf16.mxu1 %v1754_v12 }
  0x85   : > { %1572 = vmatpush3.bf16.msra.mxu0 %v1754_v12  ;;  %1673 = vmatpush3.bf16.msra.mxu1 %v1754_v12 }
  0x86   : > { %1573 = vmatprep.subr.bf16.mxu0 %v1755_v13  ;;  %1666 = vmatprep.subr.bf16.mxu1 %v1755_v13 }
  0x89   : > { %1574 = vmatpush3.bf16.msra.mxu0 %v1755_v13  ;;  %1674 = vmatpush3.bf16.msra.mxu1 %v1755_v13 }
  0x8c   : > { %1576 = vmatmul.mubr.bf16.vlgmr.msra.gmra.mrb[0].mxu0 %v332_v18  ;;  %1580 = vmatmul.mubr.bf16.vlgmr.msra.gmra.mrb[0].mxu1 %v334_v19 }
 0x15f   : > { %v1577_v21 = vpop.f32.mrb[0].mxu0  ;;  %v1581_v22 = vpop.f32.mrb[0].mxu1 }
 0x160   : > { %v449_v23 = vadd.f32 %v1577_v21, %v1462_v20  ;;  %v465_v24 = vadd.f32 %v1581_v22, %v1462_v20  ;;  %v440_v25 = vpop.f32.mrb[1].mxu0  ;;  %v456_v26 = vpop.f32.mrb[1].mxu1 }
 0x161   : > { %v441_v27 = vadd.f32 %v1462_v20, %v440_v25  ;;  %v457_v28 = vadd.f32 %v1462_v20, %v456_v26  ;;  %v1578_v29 = vpop.f32.mrb[2].mxu0  ;;  %v1582_v30 = vpop.f32.mrb[2].mxu1 }
 0x162   : > { %473 = vst [vmem:[#allocation3 + $0x10] sm:$0xff] %v449_v23  ;;  %477 = vst [vmem:[#allocation3 + $0x30] sm:$0xff] %v465_v24  ;;  %v452_v31 = vadd.f32 %v1578_v29, %v1462_v20  ;;  %v468_v32 = vadd.f32 %v1582_v30, %v1462_v20  ;;  %v443_v33 = vpop.f32.mrb[3].mxu0  ;;  %v459_v34 = vpop.f32.mrb[3].mxu1 }
 0x163   : > { %471 = vst [vmem:[#allocation3] sm:$0xff] %v441_v27  ;;  %475 = vst [vmem:[#allocation3 + $0x20] sm:$0xff] %v457_v28  ;;  %v444_v35 = vadd.f32 %v1462_v20, %v443_v33  ;;  %v460_v36 = vadd.f32 %v1462_v20, %v459_v34 }
 0x164   : > { %474 = vst [vmem:[#allocation3 + $0x18] sm:$0xff] %v452_v31  ;;  %478 = vst [vmem:[#allocation3 + $0x38] sm:$0xff] %v468_v32 }
 0x165   : > { %472 = vst [vmem:[#allocation3 + $0x8] sm:$0xff] %v444_v35  ;;  %476 = vst [vmem:[#allocation3 + $0x28] sm:$0xff] %v460_v36 }
 0x166 PF: > { %p1471_p1 = scmp.le.s32.totalorder %s2030_s25, 0 }
 0x167   : > { %v1756_v37 = vld [vmem:[%s2188_s26] sm:$0xff] (!%p1471_p1)   ;;  %v1757_v38 = vld [vmem:[%s2188_s26 + $0x8] sm:$0xff] (!%p1471_p1)   ;;  %vm518_vm0 = vcmask (!%p1471_p1), 261120   ;;  %v485_v44 = vld [vmem:[#allocation2 + $0x10] sm:$0xff] (!%p1471_p1) }
 0x168   : > { %482 = sbr.rel (%p1471_p1) target bundleno = 586 (0x24a), region = 64  ;;  %1583 = vmatprep.subr.bf16.mxu0 (!%p1471_p1), %v1756_v37  ;;  %1675 = vmatprep.subr.bf16.mxu1 (!%p1471_p1), %v1756_v37  ;;  %v483_v39 = vld [vmem:[#allocation2] sm:$0xff] (!%p1471_p1)  ;;  %v484_v40 = vld [vmem:[#allocation2 + $0x8] sm:$0xff] (!%p1471_p1)  ;;  %v486_v45 = vld [vmem:[#allocation2 + $0x18] sm:$0xff] (!%p1471_p1) }
 0x169   : > { %v487_v41 = vld [vmem:[#allocation2 + $0x20] sm:$0xff] (!%p1471_p1)  ;;  %1584 = vmatpush3.bf16.msra.mxu0 (!%p1471_p1), %v1756_v37  ;;  %1677 = vmatpush3.bf16.msra.mxu1 (!%p1471_p1), %v1756_v37  ;;  %v491_v42 = vpack.c.bf16 (!%p1471_p1), %v484_v40, %v483_v39  ;;  %v488_v43 = vld [vmem:[#allocation2 + $0x28] sm:$0xff] (!%p1471_p1)  ;;  %v489_v47 = vld [vmem:[#allocation2 + $0x30] sm:$0xff] (!%p1471_p1)  ;;  %v492_v49 = vpack.c.bf16 (!%p1471_p1), %v486_v45, %v485_v44 }
 0x16a   : > { %1585 = vmatprep.subr.bf16.mxu0 (!%p1471_p1), %v1757_v38  ;;  %1676 = vmatprep.subr.bf16.mxu1 (!%p1471_p1), %v1757_v38  ;;  %v493_v46 = vpack.c.bf16 (!%p1471_p1), %v488_v43, %v487_v41  ;;  %v490_v48 = vld [vmem:[#allocation2 + $0x38] sm:$0xff] (!%p1471_p1)  ;;  %v1472_v51 = vld [vmem:[%s2183_s12] ss:$0 sm:$0xff] (!%p1471_p1) }
 0x16b   : > { %1587 = vmatprep.mubr.msk.bf16.mxu0 (!%p1471_p1), %vm518_vm0, %v491_v42  ;;  %v494_v50 = vpack.c.bf16 (!%p1471_p1), %v490_v48, %v489_v47 }
 0x16c   : > { %1591 = vmatprep.mubr.msk.bf16.mxu1 (!%p1471_p1), %vm518_vm0, %v493_v46 }
 0x16d   : > { %1586 = vmatpush3.bf16.msra.mxu0 (!%p1471_p1), %v1757_v38  ;;  %1678 = vmatpush3.bf16.msra.mxu1 (!%p1471_p1), %v1757_v38 }
 0x170   : > { %1588 = vmatmul.mubr.msk.bf16.vlgmr.msra.gmra.mrb[0].mxu0 %vm518_vm0, %v492_v49  ;;  %1592 = vmatmul.mubr.msk.bf16.vlgmr.msra.gmra.mrb[0].mxu1 %vm518_vm0, %v494_v50 }
 0x243   : > { %v1589_v52 = vpop.f32.mrb[0].mxu0  ;;  %v1593_v53 = vpop.f32.mrb[0].mxu1 }
 0x244   : > { %v574_v54 = vadd.f32 %v1589_v52, %v1472_v51  ;;  %v590_v55 = vadd.f32 %v1593_v53, %v1472_v51  ;;  %v565_v56 = vpop.f32.mrb[1].mxu0  ;;  %v581_v57 = vpop.f32.mrb[1].mxu1 }
 0x245   : > { %v566_v58 = vadd.f32 %v1472_v51, %v565_v56  ;;  %v582_v59 = vadd.f32 %v1472_v51, %v581_v57  ;;  %v1590_v60 = vpop.f32.mrb[2].mxu0  ;;  %v1594_v61 = vpop.f32.mrb[2].mxu1 }
 0x246   : > { %598 = vst [vmem:[#allocation3 + $0x10] sm:$0xff] %v574_v54  ;;  %602 = vst [vmem:[#allocation3 + $0x30] sm:$0xff] %v590_v55  ;;  %v577_v62 = vadd.f32 %v1590_v60, %v1472_v51  ;;  %v593_v63 = vadd.f32 %v1594_v61, %v1472_v51  ;;  %v568_v0 = vpop.f32.mrb[3].mxu0  ;;  %v584_v1 = vpop.f32.mrb[3].mxu1 }
 0x247   : > { %596 = vst [vmem:[#allocation3] sm:$0xff] %v566_v58  ;;  %600 = vst [vmem:[#allocation3 + $0x20] sm:$0xff] %v582_v59  ;;  %v569_v2 = vadd.f32 %v1472_v51, %v568_v0  ;;  %v585_v3 = vadd.f32 %v1472_v51, %v584_v1 }
 0x248   : > { %599 = vst [vmem:[#allocation3 + $0x18] sm:$0xff] %v577_v62  ;;  %603 = vst [vmem:[#allocation3 + $0x38] sm:$0xff] %v593_v63 }
 0x249   : > { %597 = vst [vmem:[#allocation3 + $0x8] sm:$0xff] %v569_v2  ;;  %601 = vst [vmem:[#allocation3 + $0x28] sm:$0xff] %v585_v3 }
 0x24a PF: > { %s1969_s12 = smov 64   ;;  %s1970_s26 = smov 32   ;;  %v1758_v15 = vld [vmem:[%s2168_s15] sm:$0xff]   ;;  %v1971_v16 = vmov 0.0   ;;  %vm1972_vm1 = vmmov 0   ;;  %v1759_v17 = vld [vmem:[%s2168_s15 + $0x8] sm:$0xff]  }
 0x24b   : > { %1595 = vmatprep.subr.bf16.mxu0 %v1971_v16  ;;  %1599 = vmatprep.mubr.msk.bf16.mxu0 %vm1972_vm1, %v1971_v16  ;;  %vm634_vm2 = vcmask 261120   ;;  %v1760_v39 = vld [vmem:[%s2168_s15] sm:$0xff]   ;;  %v1761_v40 = vld [vmem:[%s2168_s15 + $0x8] sm:$0xff]   ;;  %p1508_p4 = scmp.ne.s32.totalorder %s2030_s25, 1 }
 0x24c   : > { %1596 = vmatpush3.bf16.msra.mxu0 %v1758_v15  ;;  %1603 = vmatprep.subr.bf16.mxu1 %v1971_v16  ;;  %v1762_v62 = vld [vmem:[%s2168_s15] sm:$0xff]   ;;  %v1763_v63 = vld [vmem:[%s2168_s15 + $0x8] sm:$0xff]   ;;  %vm1975_vm3 = vmmov (!%p1508_p4), 0  }
 0x24d   : > { %1597 = vmatprep.subr.bf16.mxu0 %v1971_v16  ;;  %1607 = vmatprep.mubr.msk.bf16.mxu1 %vm1972_vm1, %v1971_v16  ;;  %v730_v46 = vld [vmem:[#allocation3 + $0x10] sm:$0xff] }
 0x24e   : > { %v604_v4 = vld [vmem:[#allocation3] sm:$0xff]  ;;  %1604 = vmatpush3.bf16.msra.mxu1 %v1760_v39 }
 0x24f   : > { %1772 = vtanh.f32 %v604_v4  ;;  %v1479_v6 = vmul.f32 -1.442695, %v604_v4  ;;  %1605 = vmatprep.subr.bf16.mxu1 %v1971_v16 }
 0x250   : > { %1598 = vmatpush3.bf16.msra.mxu0 %v1759_v17  ;;  %v636_v23 = vld [vmem:[#allocation3 + $0x8] sm:$0xff] }
 0x251   : > { %1774 = vpow2.f32 %v1479_v6  ;;  %1611 = vmatprep.subr.bf16.mxu0 %v1971_v16 }
 0x252   : > { %1606 = vmatpush3.bf16.msra.mxu1 %v1761_v40 }
 0x253   : > { %1619 = vmatprep.subr.bf16.mxu1 %v1971_v16 }
 0x259   : > { %v1773_v5 = vpop.eup %1772 }
 0x25a   : > { %614 = vrot.lane.b32.xlu0 %v1773_v5, %s1969_s12  ;;  %v824_v5 = vld [vmem:[#allocation3 + $0x18] sm:$0xff] }
 0x25b   : > { %v1775_v7 = vpop.eup %1774 }
 0x25c   : > { %v608_v8 = vadd.f32 1.0, %v1775_v7 }
 0x25e   : > { %1776 = vrcp.f32 %v608_v8 }
 0x268   : > { %v1777_v9 = vpop.eup %1776 }
 0x269   : > { %v612_v12 = vmul.f32 0.0, %v1777_v9 }
 0x2cc   : > { %v615_v10 = vpop.permute.xlu0 %614 }
 0x2cd   : > { %v617_v11 = vmul.f32 %v1777_v9, %v615_v10 }
 0x2cf   : > { %619 = vrot.lane.b32.xlu0 %v617_v11, %s1970_s26 }
 0x341   : > { %v620_v13 = vpop.permute.xlu0 %619 }
 0x342   : > { %v622_v14 = vadd.f32 %v620_v13, %v612_v12 }
 0x344   : > { %1778 = vtanh.f32 %v622_v14 }
 0x34e   : > { %v1779_v18 = vpop.eup %1778 }
 0x34f   : > { %625 = vrot.lane.b32.xlu1 %v1779_v18, %s1969_s12 }
 0x3c1   : > { %v626_v19 = vpop.permute.xlu1 %625 }
 0x3c2   : > { %v2246_v20 = vmul.f32 %v1777_v9, %v626_v19 }
 0x3c4   : > { %v629_v21 = vpack.c.bf16 %v2246_v20, %v2246_v20 }
 0x3c6   : > { %642 = vrot.lane.b32.xlu1 %v629_v21, %s1970_s26 }
 0x438   : > { %v643_v22 = vpop.permute.xlu1 %642 }
 0x439   : > { %1600 = vmatmul.mubr.msk.bf16.vlgmr.msra.gmra.mrb[0].mxu0 %vm634_vm2, %v643_v22 }
 0x43a   : > { %1615 = vmatprep.mubr.msk.bf16.mxu0 %vm1972_vm1, %v1971_v16  ;;  %1612 = vmatpush3.bf16.msra.mxu0 %v1762_v62 }
 0x43b   : > { %1613 = vmatprep.subr.bf16.mxu0 %v1971_v16 }
 0x43e   : > { %1614 = vmatpush3.bf16.msra.mxu0 %v1763_v63 }
 0x43f   : > { %1627 = vmatprep.subr.bf16.mxu0 %v1971_v16 }
 0x50c   : > { %v693_v24 = vpop.f32.mrb[0].mxu0 }
 0x50d   : > { %v699_v25 = vadd.f32 %v693_v24, %v636_v23  ;;  %v1601_v26 = vpop.f32.mrb[1].mxu0  ;;  %v1764_v23 = vld [vmem:[%s2168_s15] sm:$0xff]   ;;  %v1765_v24 = vld [vmem:[%s2168_s15 + $0x8] sm:$0xff]  }
 0x50e   : > { %v696_v27 = vpop.f32.mrb[2].mxu0 }
 0x50f   : > { %1780 = vtanh.f32 %v699_v25  ;;  %v1602_v28 = vpop.f32.mrb[3].mxu0  ;;  %v1483_v30 = vmul.f32 -1.442695, %v699_v25 }
 0x511   : > { %1782 = vpow2.f32 %v1483_v30  ;;  %v918_v30 = vld [vmem:[#allocation3 + $0x20] sm:$0xff] }
 0x519   : > { %v1781_v29 = vpop.eup %1780 }
 0x51a   : > { %709 = vrot.lane.b32.xlu0 %v1781_v29, %s1969_s12 }
 0x51b   : > { %v1783_v31 = vpop.eup %1782 }
 0x51c   : > { %v703_v32 = vadd.f32 1.0, %v1783_v31 }
 0x51e   : > { %1784 = vrcp.f32 %v703_v32 }
 0x528   : > { %v1785_v33 = vpop.eup %1784 }
 0x529   : > { %v707_v36 = vmul.f32 %v1785_v33, %v622_v14 }
 0x58c   : > { %v710_v34 = vpop.permute.xlu0 %709 }
 0x58d   : > { %v712_v35 = vmul.f32 %v1785_v33, %v710_v34 }
 0x58f   : > { %714 = vrot.lane.b32.xlu1 %v712_v35, %s1970_s26 }
 0x601   : > { %v715_v37 = vpop.permute.xlu1 %714 }
 0x602   : > { %v717_v38 = vadd.f32 %v715_v37, %v707_v36 }
 0x604   : > { %1786 = vtanh.f32 %v717_v38 }
 0x60e   : > { %v1787_v41 = vpop.eup %1786 }
 0x60f   : > { %720 = vrot.lane.b32.xlu0 %v1787_v41, %s1969_s12 }
 0x681   : > { %v721_v42 = vpop.permute.xlu0 %720 }
 0x682   : > { %v2261_v43 = vmul.f32 %v1785_v33, %v721_v42 }
 0x684   : > { %v724_v44 = vpack.c.bf16 %v2261_v43, %v2261_v43 }
 0x686   : > { %736 = vrot.lane.b32.xlu1 %v724_v44, %s1970_s26 }
 0x6f8   : > { %v737_v45 = vpop.permute.xlu1 %736 }
 0x6f9   : > { %1608 = vmatmul.mubr.msk.bf16.vlgmr.msra.gmra.mrb[0].mxu1 %vm634_vm2, %v737_v45 }
 0x6fa   : > { %1623 = vmatprep.mubr.msk.bf16.mxu1 %vm1972_vm1, %v1971_v16  ;;  %1620 = vmatpush3.bf16.msra.mxu1 %v1764_v23 }
 0x6fb   : > { %1621 = vmatprep.subr.bf16.mxu1 %v1971_v16 }
 0x6fe   : > { %1622 = vmatpush3.bf16.msra.mxu1 %v1765_v24 }
 0x6ff   : > { %1635 = vmatprep.subr.bf16.mxu1 %v1971_v16 }
 0x7cc   : > { %v787_v47 = vpop.f32.mrb[0].mxu1 }
 0x7cd   : > { %v793_v48 = vadd.f32 %v787_v47, %v730_v46  ;;  %v1609_v49 = vpop.f32.mrb[1].mxu1  ;;  %v1766_v47 = vld [vmem:[%s2168_s15] sm:$0xff]  }
 0x7ce   : > { %v790_v50 = vpop.f32.mrb[2].mxu1 }
 0x7cf   : > { %1788 = vtanh.f32 %v793_v48  ;;  %v1610_v51 = vpop.f32.mrb[3].mxu1  ;;  %v1487_v53 = vmul.f32 -1.442695, %v793_v48  ;;  %v1767_v48 = vld [vmem:[%s2168_s15 + $0x8] sm:$0xff]  }
 0x7d1   : > { %1790 = vpow2.f32 %v1487_v53 }
 0x7d9   : > { %v1789_v52 = vpop.eup %1788 }
 0x7da   : > { %803 = vrot.lane.b32.xlu0 %v1789_v52, %s1969_s12 }
 0x7db   : > { %v1791_v54 = vpop.eup %1790 }
 0x7dc   : > { %v797_v55 = vadd.f32 1.0, %v1791_v54  ;;  %v1012_v54 = vld [vmem:[#allocation3 + $0x28] sm:$0xff] }
 0x7de   : > { %1792 = vrcp.f32 %v797_v55 }
 0x7e8   : > { %v1793_v56 = vpop.eup %1792 }
 0x7e9   : > { %v801_v59 = vmul.f32 %v1793_v56, %v717_v38 }
 0x84c   : > { %v804_v57 = vpop.permute.xlu0 %803 }
 0x84d   : > { %v806_v58 = vmul.f32 %v1793_v56, %v804_v57 }
 0x84f   : > { %808 = vrot.lane.b32.xlu1 %v806_v58, %s1970_s26 }
 0x8c1   : > { %v809_v60 = vpop.permute.xlu1 %808 }
 0x8c2   : > { %v811_v61 = vadd.f32 %v809_v60, %v801_v59 }
 0x8c4   : > { %1794 = vtanh.f32 %v811_v61 }
 0x8ce   : > { %v1795_v0 = vpop.eup %1794 }
 0x8cf   : > { %814 = vrot.lane.b32.xlu0 %v1795_v0, %s1969_s12 }
 0x941   : > { %v815_v1 = vpop.permute.xlu0 %814 }
 0x942   : > { %v2276_v2 = vmul.f32 %v1793_v56, %v815_v1 }
 0x944   : > { %v818_v3 = vpack.c.bf16 %v2276_v2, %v2276_v2 }
 0x946   : > { %830 = vrot.lane.b32.xlu1 %v818_v3, %s1970_s26 }
 0x9b8   : > { %v831_v4 = vpop.permute.xlu1 %830 }
 0x9b9   : > { %1616 = vmatmul.mubr.msk.bf16.vlgmr.msra.gmra.mrb[4].mxu0 %vm634_vm2, %v831_v4 }
 0x9ba   : > { %1631 = vmatprep.mubr.msk.bf16.mxu0 %vm1972_vm1, %v1971_v16  ;;  %1628 = vmatpush3.bf16.msra.mxu0 %v1766_v47 }
 0x9bb   : > { %1629 = vmatprep.subr.bf16.mxu0 %v1971_v16 }
 0x9be   : > { %1630 = vmatpush3.bf16.msra.mxu0 %v1767_v48 }
 0x9bf   : > { %1643 = vmatprep.subr.bf16.mxu0 %v1971_v16 }
 0xa8c   : > { %v881_v6 = vpop.f32.mrb[4].mxu0 }
 0xa8d   : > { %v887_v7 = vadd.f32 %v881_v6, %v824_v5  ;;  %v1617_v8 = vpop.f32.mrb[5].mxu0 }
 0xa8e   : > { %v884_v9 = vpop.f32.mrb[6].mxu0  ;;  %v1769_v8 = vld [vmem:[%s2168_s15 + $0x8] sm:$0xff]  }
 0xa8f   : > { %1796 = vtanh.f32 %v887_v7  ;;  %v1618_v10 = vpop.f32.mrb[7].mxu0  ;;  %v1491_v12 = vmul.f32 -1.442695, %v887_v7  ;;  %v1768_v7 = vld [vmem:[%s2168_s15] sm:$0xff]  }
 0xa91   : > { %1798 = vpow2.f32 %v1491_v12 }
 0xa99   : > { %v1797_v11 = vpop.eup %1796 }
 0xa9a   : > { %897 = vrot.lane.b32.xlu0 %v1797_v11, %s1969_s12 }
 0xa9b   : > { %v1799_v13 = vpop.eup %1798 }
 0xa9c   : > { %v891_v14 = vadd.f32 1.0, %v1799_v13 }
 0xa9e   : > { %1800 = vrcp.f32 %v891_v14  ;;  %v1106_v14 = vld [vmem:[#allocation3 + $0x30] sm:$0xff] }
 0xaa8   : > { %v1801_v15 = vpop.eup %1800 }
 0xaa9   : > { %v895_v19 = vmul.f32 %v1801_v15, %v811_v61 }
 0xb0c   : > { %v898_v17 = vpop.permute.xlu0 %897 }
 0xb0d   : > { %v900_v18 = vmul.f32 %v1801_v15, %v898_v17 }
 0xb0f   : > { %902 = vrot.lane.b32.xlu1 %v900_v18, %s1970_s26 }
 0xb81   : > { %v903_v21 = vpop.permute.xlu1 %902 }
 0xb82   : > { %v905_v22 = vadd.f32 %v903_v21, %v895_v19 }
 0xb84   : > { %1802 = vtanh.f32 %v905_v22 }
 0xb8e   : > { %v1803_v25 = vpop.eup %1802 }
 0xb8f   : > { %908 = vrot.lane.b32.xlu0 %v1803_v25, %s1969_s12 }
 0xc01   : > { %v909_v26 = vpop.permute.xlu0 %908 }
 0xc02   : > { %v2291_v27 = vmul.f32 %v1801_v15, %v909_v26 }
 0xc04   : > { %v912_v28 = vpack.c.bf16 %v2291_v27, %v2291_v27 }
 0xc06   : > { %924 = vrot.lane.b32.xlu1 %v912_v28, %s1970_s26 }
 0xc78   : > { %v925_v29 = vpop.permute.xlu1 %924 }
 0xc79   : > { %1624 = vmatmul.mubr.msk.bf16.vlgmr.msra.gmra.mrb[4].mxu1 %vm634_vm2, %v925_v29 }
 0xc7a   : > { %1639 = vmatprep.mubr.msk.bf16.mxu1 %vm1972_vm1, %v1971_v16  ;;  %1636 = vmatpush3.bf16.msra.mxu1 %v1768_v7 }
 0xc7b   : > { %1637 = vmatprep.subr.bf16.mxu1 %v1971_v16 }
 0xc7e   : > { %1638 = vmatpush3.bf16.msra.mxu1 %v1769_v8 }
 0xd4c   : > { %v975_v31 = vpop.f32.mrb[4].mxu1 }
 0xd4d   : > { %v981_v32 = vadd.f32 %v975_v31, %v918_v30  ;;  %v1625_v33 = vpop.f32.mrb[5].mxu1 }
 0xd4e   : > { %v978_v34 = vpop.f32.mrb[6].mxu1  ;;  %v1770_v33 = vld [vmem:[%s2168_s15] sm:$0xff]  }
 0xd4f   : > { %1804 = vtanh.f32 %v981_v32  ;;  %v1626_v35 = vpop.f32.mrb[7].mxu1  ;;  %v1495_v37 = vmul.f32 -1.442695, %v981_v32  ;;  %v1771_v34 = vld [vmem:[%s2168_s15 + $0x8] sm:$0xff]   ;;  %s1973_s15 = smov (!%p1508_p4), 32  }
 0xd51   : > { %1806 = vpow2.f32 %v1495_v37 }
 0xd59   : > { %v1805_v36 = vpop.eup %1804 }
 0xd5a   : > { %991 = vrot.lane.b32.xlu0 %v1805_v36, %s1969_s12 }
 0xd5b   : > { %v1807_v38 = vpop.eup %1806 }
 0xd5c   : > { %v985_v39 = vadd.f32 1.0, %v1807_v38 }
 0xd5e   : > { %1808 = vrcp.f32 %v985_v39 }
 0xd68   : > { %v1809_v40 = vpop.eup %1808 }
 0xd69   : > { %v989_v44 = vmul.f32 %v1809_v40, %v905_v22 }
 0xdcc   : > { %v992_v41 = vpop.permute.xlu0 %991 }
 0xdcd   : > { %v994_v42 = vmul.f32 %v1809_v40, %v992_v41 }
 0xdcf   : > { %996 = vrot.lane.b32.xlu1 %v994_v42, %s1970_s26 }
 0xe41   : > { %v997_v45 = vpop.permute.xlu1 %996 }
 0xe42   : > { %v999_v46 = vadd.f32 %v997_v45, %v989_v44 }
 0xe44   : > { %1810 = vtanh.f32 %v999_v46 }
 0xe4e   : > { %v1811_v49 = vpop.eup %1810 }
 0xe4f   : > { %1002 = vrot.lane.b32.xlu0 %v1811_v49, %s1969_s12 }
 0xec1   : > { %v1003_v50 = vpop.permute.xlu0 %1002 }
 0xec2   : > { %v2306_v51 = vmul.f32 %v1809_v40, %v1003_v50  ;;  %v1200_v40 = vld [vmem:[#allocation3 + $0x38] sm:$0xff] }
 0xec4   : > { %v1006_v52 = vpack.c.bf16 %v2306_v51, %v2306_v51 }
 0xec6   : > { %1018 = vrot.lane.b32.xlu1 %v1006_v52, %s1970_s26 }
 0xf38   : > { %v1019_v53 = vpop.permute.xlu1 %1018 }
 0xf39   : > { %1632 = vmatmul.mubr.msk.bf16.vlgmr.msra.gmra.mrb[8].mxu0 %vm634_vm2, %v1019_v53 }
 0xf3a   : > { %1647 = vmatprep.mubr.msk.bf16.mxu0 %vm1972_vm1, %v1971_v16  ;;  %1644 = vmatpush3.bf16.msra.mxu0 %v1770_v33 }
 0xf3b   : > { %1645 = vmatprep.subr.bf16.mxu0 %v1971_v16 }
 0xf3e   : > { %1646 = vmatpush3.bf16.msra.mxu0 %v1771_v34 }
0x100c   : > { %v1069_v55 = vpop.f32.mrb[8].mxu0 }
0x100d   : > { %v1075_v56 = vadd.f32 %v1069_v55, %v1012_v54  ;;  %v1633_v57 = vpop.f32.mrb[9].mxu0 }
0x100e   : > { %v1072_v58 = vpop.f32.mrb[10].mxu0 }
0x100f   : > { %1812 = vtanh.f32 %v1075_v56  ;;  %v1634_v59 = vpop.f32.mrb[11].mxu0  ;;  %v1499_v61 = vmul.f32 -1.442695, %v1075_v56 }
0x1011   : > { %1814 = vpow2.f32 %v1499_v61 }
0x1019   : > { %v1813_v60 = vpop.eup %1812 }
0x101a   : > { %1085 = vrot.lane.b32.xlu0 %v1813_v60, %s1969_s12 }
0x101b   : > { %v1815_v62 = vpop.eup %1814 }
0x101c   : > { %v1079_v63 = vadd.f32 1.0, %v1815_v62 }
0x101e   : > { %1816 = vrcp.f32 %v1079_v63 }
0x1028   : > { %v1817_v0 = vpop.eup %1816 }
0x1029   : > { %v1083_v4 = vmul.f32 %v1817_v0, %v999_v46 }
0x108c   : > { %v1086_v1 = vpop.permute.xlu0 %1085 }
0x108d   : > { %v1088_v3 = vmul.f32 %v1817_v0, %v1086_v1  ;;  %v1836_v1 = vld [vmem:[#allocation6] sm:$0xff] (!%p1508_p4)  }
0x108f   : > { %1090 = vrot.lane.b32.xlu1 %v1088_v3, %s1970_s26  ;;  %v1837_v3 = vld [vmem:[#allocation6 + $0x8] sm:$0xff] (!%p1508_p4)  }
0x1101   : > { %v1091_v5 = vpop.permute.xlu1 %1090 }
0x1102   : > { %v1093_v6 = vadd.f32 %v1091_v5, %v1083_v4  ;;  %v1509_v5 = vld [vmem:[#allocation8] ss:$0 sm:$0xff] (!%p1508_p4) }
0x1104   : > { %1818 = vtanh.f32 %v1093_v6 }
0x110e   : > { %v1819_v9 = vpop.eup %1818 }
0x110f   : > { %1096 = vrot.lane.b32.xlu0 %v1819_v9, %s1969_s12 }
0x1181   : > { %v1097_v10 = vpop.permute.xlu0 %1096 }
0x1182   : > { %v2320_v11 = vmul.f32 %v1817_v0, %v1097_v10 }
0x1184   : > { %v1100_v12 = vpack.c.bf16 %v2320_v11, %v2320_v11 }
0x1186   : > { %1112 = vrot.lane.b32.xlu1 %v1100_v12, %s1970_s26 }
0x11f8   : > { %v1113_v13 = vpop.permute.xlu1 %1112 }
0x11f9   : > { %1640 = vmatmul.mubr.msk.bf16.vlgmr.msra.gmra.mrb[8].mxu1 %vm634_vm2, %v1113_v13 }
0x12cc   : > { %v1163_v15 = vpop.f32.mrb[8].mxu1 }
0x12cd   : > { %v1169_v17 = vadd.f32 %v1163_v15, %v1106_v14  ;;  %v1641_v18 = vpop.f32.mrb[9].mxu1 }
0x12ce   : > { %v1166_v19 = vpop.f32.mrb[10].mxu1 }
0x12cf   : > { %1820 = vtanh.f32 %v1169_v17  ;;  %v1642_v21 = vpop.f32.mrb[11].mxu1  ;;  %v1503_v23 = vmul.f32 -1.442695, %v1169_v17 }
0x12d1   : > { %1822 = vpow2.f32 %v1503_v23 }
0x12d9   : > { %v1821_v22 = vpop.eup %1820 }
0x12da   : > { %1179 = vrot.lane.b32.xlu0 %v1821_v22, %s1969_s12 }
0x12db   : > { %v1823_v24 = vpop.eup %1822 }
0x12dc   : > { %v1173_v25 = vadd.f32 1.0, %v1823_v24 }
0x12de   : > { %1824 = vrcp.f32 %v1173_v25 }
0x12e8   : > { %v1825_v26 = vpop.eup %1824 }
0x12e9   : > { %v1177_v30 = vmul.f32 %v1825_v26, %v1093_v6 }
0x134c   : > { %v1180_v28 = vpop.permute.xlu0 %1179 }
0x134d   : > { %v1182_v29 = vmul.f32 %v1825_v26, %v1180_v28 }
0x134f   : > { %1184 = vrot.lane.b32.xlu1 %v1182_v29, %s1970_s26 }
0x13c1   : > { %v1185_v31 = vpop.permute.xlu1 %1184 }
0x13c2   : > { %v1187_v32 = vadd.f32 %v1185_v31, %v1177_v30 }
0x13c4   : > { %1826 = vtanh.f32 %v1187_v32 }
0x13ce   : > { %v1827_v35 = vpop.eup %1826 }
0x13cf   : > { %1190 = vrot.lane.b32.xlu0 %v1827_v35, %s1969_s12 }
0x1441   : > { %v1191_v36 = vpop.permute.xlu0 %1190 }
0x1442   : > { %v1193_v37 = vmul.f32 %v1825_v26, %v1191_v36 }
0x1444   : > { %v1194_v38 = vpack.c.bf16 %v1193_v37, %v1193_v37 }
0x1446   : > { %1206 = vrot.lane.b32.xlu1 %v1194_v38, %s1970_s26 }
0x14b8   : > { %v1207_v39 = vpop.permute.xlu1 %1206 }
0x14b9   : > { %1648 = vmatmul.mubr.msk.bf16.vlgmr.msra.gmra.mrb[12].mxu0 %vm634_vm2, %v1207_v39 }
0x158c   : > { %v1257_v41 = vpop.f32.mrb[12].mxu0 }
0x158d   : > { %v1263_v42 = vadd.f32 %v1257_v41, %v1200_v40  ;;  %v1649_v44 = vpop.f32.mrb[13].mxu0 }
0x158e   : > { %v1260_v45 = vpop.f32.mrb[14].mxu0 }
0x158f   : > { %1828 = vtanh.f32 %v1263_v42  ;;  %v1650_v46 = vpop.f32.mrb[15].mxu0  ;;  %v1507_v47 = vmul.f32 -1.442695, %v1263_v42 }
0x1591   : > { %1830 = vpow2.f32 %v1507_v47 }
0x1599   : > { %v1829_v16 = vpop.eup %1828 }
0x159a   : > { %1273 = vrot.lane.b32.xlu0 %v1829_v16, %s1969_s12 }
0x159b   : > { %v1831_v48 = vpop.eup %1830 }
0x159c   : > { %v1267_v49 = vadd.f32 1.0, %v1831_v48 }
0x159e   : > { %1832 = vrcp.f32 %v1267_v49 }
0x15a8   : > { %v1833_v50 = vpop.eup %1832 }
0x15a9   : > { %v1271_v54 = vmul.f32 %v1833_v50, %v1187_v32 }
0x160c   : > { %v1274_v52 = vpop.permute.xlu0 %1273 }
0x160d   : > { %v1276_v53 = vmul.f32 %v1833_v50, %v1274_v52 }
0x160f   : > { %1278 = vrot.lane.b32.xlu1 %v1276_v53, %s1970_s26 }
0x1613   : > { %631 = vrot.lane.b32.xlu1 %v2246_v20, %s1970_s26 }
0x1617   : > { %820 = vrot.lane.b32.xlu1 %v2276_v2, %s1970_s26 }
0x161b   : > { %1008 = vrot.lane.b32.xlu1 %v2306_v51, %s1970_s26 }
0x161f   : > { %1196 = vrot.lane.b32.xlu1 %v1193_v37, %s1970_s26 }
0x1681   : > { %v1279_v55 = vpop.permute.xlu1 %1278 }
0x1682   : > { %v1281_v56 = vadd.f32 %v1279_v55, %v1271_v54 }
0x1684   : > { %1834 = vtanh.f32 %v1281_v56 }
0x1685   : > { %v632_v57 = vpop.permute.xlu1 %631 }
0x1686   : > { %635 = vst.msk [vmem:[#allocation2] sm:$0xff] %vm634_vm2, %v632_v57 }
0x1689   : > { %v821_v58 = vpop.permute.xlu1 %820 }
0x168a   : > { %823 = vst.msk [vmem:[#allocation2 + $0x10] sm:$0xff] %vm634_vm2, %v821_v58 }
0x168d   : > { %v1009_v59 = vpop.permute.xlu1 %1008 }
0x168e   : > { %v1835_v20 = vpop.eup %1834  ;;  %1011 = vst.msk [vmem:[#allocation2 + $0x20] sm:$0xff] %vm634_vm2, %v1009_v59 }
0x168f   : > { %1284 = vrot.lane.b32.xlu0 %v1835_v20, %s1969_s12 }
0x1691   : > { %v1197_v2 = vpop.permute.xlu1 %1196 }
0x1692   : > { %1199 = vst.msk [vmem:[#allocation2 + $0x30] sm:$0xff] %vm634_vm2, %v1197_v2 }
0x1693   : > { %726 = vrot.lane.b32.xlu0 %v2261_v43, %s1970_s26 }
0x1697   : > { %914 = vrot.lane.b32.xlu0 %v2291_v27, %s1970_s26  ;;  %v1974_v27 = vmov (!%p1508_p4), 0.0  }
0x1698   : > { %1651 = vmatprep.subr.bf16.mxu0 (!%p1508_p4), %v1974_v27  ;;  %1655 = vmatprep.mubr.msk.bf16.mxu0 (!%p1508_p4), %vm1975_vm3, %v1974_v27 }
0x1699   : > { %1652 = vmatpush3.bf16.msra.mxu0 (!%p1508_p4), %v1836_v1 }
0x169a   : > { %1653 = vmatprep.subr.bf16.mxu0 (!%p1508_p4), %v1974_v27 }
0x169b   : > { %1102 = vrot.lane.b32.xlu0 %v2320_v11, %s1970_s26 }
0x169d   : > { %1654 = vmatpush3.bf16.msra.mxu0 (!%p1508_p4), %v1837_v3 }
0x1701   : > { %v1285_v51 = vpop.permute.xlu0 %1284 }
0x1702   : > { %v1287_v60 = vmul.f32 %v1833_v50, %v1285_v51 }
0x1704   : > { %v1288_v61 = vpack.c.bf16 %v1287_v60, %v1287_v60  ;;  %1290 = vrot.lane.b32.xlu0 %v1287_v60, %s1970_s26 }
0x1705   : > { %v727_v62 = vpop.permute.xlu0 %726 }
0x1706   : > { %729 = vst.msk [vmem:[#allocation2 + $0x8] sm:$0xff] %vm634_vm2, %v727_v62 }
0x1708   : > { %1310 = vrot.lane.b32.xlu0 (!%p1508_p4), %v1288_v61, %s1973_s15 }
0x1709   : > { %v915_v63 = vpop.permute.xlu0 %914 }
0x170a   : > { %917 = vst.msk [vmem:[#allocation2 + $0x18] sm:$0xff] %vm634_vm2, %v915_v63 }
0x170d   : > { %v1103_v0 = vpop.permute.xlu0 %1102 }
0x170e   : > { %1105 = vst.msk [vmem:[#allocation2 + $0x28] sm:$0xff] %vm634_vm2, %v1103_v0 }
0x1771   : > { %1297 = sbr.rel (%p1508_p4) target bundleno = 6226 (0x1852), region = 68 }
0x1776   : > { %v1291_v43 = vpop.permute.xlu0 %1290 }
0x1777   : > { %1293 = vst.msk [vmem:[#allocation2 + $0x38] sm:$0xff] %vm634_vm2, %v1291_v43 }
0x177a   : > { %v1311_v4 = vpop.permute.xlu0 %1310 }
0x177b   : > { %1656 = vmatmul.mubr.msk.bf16.vlgmr.msra.gmra.mrb[0].mxu0 %vm634_vm2, %v1311_v4 }
0x184e   : > { %v1361_v6 = vpop.f32.mrb[0].mxu0 }
0x184f   : > { %v1362_v7 = vadd.f32 %v1509_v5, %v1361_v6  ;;  %v1657_v8 = vpop.f32.mrb[1].mxu0 }
0x1850   : > { %v1364_v9 = vpop.f32.mrb[2].mxu0 }
0x1851   : > { %1367 = vst [vmem:[%s2383_s6] sm:$0xff] %v1362_v7  ;;  %v1658_v10 = vpop.f32.mrb[3].mxu0 }
0x1852 PF: > { %s2396_s30 = smov %s2120_s21  ;;  %p17_p5 = scmp.ge.s32.totalorder %s2109_s16, 4  }
0x1853   : > { %s2397_s21 = smov %s1954_s22  ;;  %s2398_s22 = smov %s1958_s23 }
0x1854   : > { %s2399_s23 = smov %s2396_s30  ;;  %s2400_s24 = smov %s2109_s16 }
0x1855   :  { %19 = sbr.rel (!%p17_p5) target bundleno = 4 (0x4), region = 106 }
0x185c   :  { %1379 = vsyncpa [#allocation5], 1 }
0x185d   :  { %1381 = vsyncpa [#allocation5 + $0x1], 1 }
0x185e   :  { %1382 = vsyncpa [#allocation7], 1 }

</bundles_post_ra>
